<compile_context>
chip_gen: v7x
topology: tpu7x:2x2x1
jax: 0.10.0
libtpu: 0.0.40
codegen_flags: <defaults>
</compile_context>

<pallas_src>
import functools

import jax
import jax.numpy as jnp
import numpy as np
from jax.experimental import pallas as pl
from jax.experimental.pallas import tpu as pltpu


# ----------------------------------------------------------------------------------
# Fused encoder kernel: in-kernel embedding gather + bidirectional LSTM over the full
# sequence (one block-diagonal MXU push per step for both directions) + decoder_cell_init.
# Gate order matches PyTorch: i, f, g, o.
# ----------------------------------------------------------------------------------
def _encoder_kernel(residual,
                    src_ref,      # (T, B) int32, SMEM
                    emb_ref,      # (V, 1, E) f32, VMEM
                    w_ref,        # (2*(E+H), 4H) mxu_dtype, VMEM (fwd rows then bwd rows)
                    bf_ref,       # (1, 4H) f32
                    bb_ref,       # (1, 4H) f32
                    wdec_ref,     # (2H, H) mxu_dtype
                    bdec_ref,     # (1, H) f32
                    enc_ref,      # (T, B, 2H) f32   out
                    cell_ref,     # (B, H) f32       out
                    state_ref):   # (B, H) f32       out
    T, B, two_h = enc_ref.shape
    H = two_h // 2
    E = emb_ref.shape[2]
    K = E + H
    mxu_dtype = w_ref.dtype

    w_big = w_ref[...]            # (2K, 4H), loaded once
    wdec = wdec_ref[...]
    bdec = bdec_ref[...]

    # Hoisted out of the (unrolled) loop: JAX does not CSE broadcast_in_dim.
    bias_big = jnp.concatenate(
        [jnp.broadcast_to(bf_ref[...], (B, 4 * H)),
         jnp.broadcast_to(bb_ref[...], (B, 4 * H))], axis=0)        # (2B, 4H) f32
    zpad = jnp.zeros((B, K), jnp.float32)

    def gather(t):
        # In-kernel embedding gather: scalar token ids from SMEM index the (V,1,E)
        # table on its leading (untiled) axis -> (1, E) rows.
        rows = [emb_ref[src_ref[t, b]] for b in range(B)]
        return jnp.concatenate(rows, axis=0)                        # (B, E) f32

    def body(t, carry):
        h_all, c_all = carry          # (2B, H): rows [:B]=forward, [B:]=backward
        tb = T - 1 - t
        xf = gather(t)                # forward input  at time t
        xb = gather(tb)               # backward input at time T-1-t

        # Block-diagonal operand: ONE MXU push for both directions.
        xh_f = jnp.concatenate([xf, h_all[:B]], axis=1)             # (B, K)
        xh_b = jnp.concatenate([xb, h_all[B:]], axis=1)
        x_blk = jnp.concatenate(
            [jnp.concatenate([xh_f, zpad], axis=1),
             jnp.concatenate([zpad, xh_b], axis=1)],
            axis=0).astype(mxu_dtype)                               # (2B, 2K)
        gates = jnp.dot(x_blk, w_big,
                        preferred_element_type=jnp.float32) + bias_big

        # One full-slab sigmoid + one small tanh (fewer sliced EUP pushes).
        sig = jax.nn.sigmoid(gates)
        g = jnp.tanh(gates[:, 2 * H:3 * H])
        i = sig[:, 0:H]
        f = sig[:, H:2 * H]
        o = sig[:, 3 * H:4 * H]
        c_new = f * c_all + i * g
        h_new = o * jnp.tanh(c_new)

        # residual_var = cat([emb, emb], dim=2): fwd half gets emb[t], bwd half emb[tb].
        if residual:                                                # requires E == H
            out_all = h_new + jnp.concatenate([xf, xb], axis=0)
        else:
            out_all = h_new

        # Direct writes into the VMEM-resident output: no scratch, no final concat.
        enc_ref[t, :, 0:H] = out_all[:B]
        enc_ref[tb, :, H:2 * H] = out_all[B:]
        return h_new, c_new

    z = jnp.zeros((2 * B, H), jnp.float32)
    unroll = True if T <= 16 else 4      # cap unroll for longer sequences
    _, c_fin = jax.lax.fori_loop(0, T, body, (z, z), unroll=unroll)

    # Fused decoder_cell_init: Linear(2H -> H) + tanh on the final cell states
    # (last_cell[0] = forward final cell, last_cell[1] = backward final cell).
    c_cat = jnp.concatenate([c_fin[:B], c_fin[B:]], axis=1).astype(mxu_dtype)
    cell = jnp.dot(c_cat, wdec, preferred_element_type=jnp.float32) + bdec
    cell_ref[...] = cell
    state_ref[...] = jnp.tanh(cell)


# ----------------------------------------------------------------------------------
# One-time (parameter-load time) packing: fuse [W_ih; W_hh] per direction, stack
# both directions for the block-diagonal matmul, cast MXU operands, reshape the
# embedding table so token ids index a leading untiled axis.
# ----------------------------------------------------------------------------------
def pack_params(raw, mxu_dtype=jnp.bfloat16):
    V, E = raw["embedding"].shape
    w_f = jnp.concatenate([raw["wih_f"], raw["whh_f"]], axis=0)     # (E+H, 4H)
    w_b = jnp.concatenate([raw["wih_b"], raw["whh_b"]], axis=0)
    return dict(
        embedding=raw["embedding"].reshape(V, 1, E),                # (V, 1, E) f32
        w_big=jnp.concatenate([w_f, w_b], axis=0).astype(mxu_dtype),
        b_f=raw["b_f"],
        b_b=raw["b_b"],
        w_dec=raw["w_dec"].astype(mxu_dtype),
        b_dec=raw["b_dec"],
    )


# ----------------------------------------------------------------------------------
# Encoder.forward
# ----------------------------------------------------------------------------------
@functools.partial(jax.jit, static_argnames=("residual",))
def encoder_forward(src_sents, packed, residual=True):
    T, B = src_sents.shape
    _, _, E = packed["embedding"].shape
    H = packed["w_dec"].shape[1]
    if residual:
        assert E == H, "residual path requires embedding_size == hidden_size"

    vmem = pl.BlockSpec(memory_space=pltpu.MemorySpace.VMEM)
    smem = pl.BlockSpec(memory_space=pltpu.MemorySpace.SMEM)

    enc, cell, state = pl.pallas_call(
        functools.partial(_encoder_kernel, residual),
        out_shape=(
            jax.ShapeDtypeStruct((T, B, 2 * H), jnp.float32),       # enc_output
            jax.ShapeDtypeStruct((B, H), jnp.float32),              # dec_init_cell
            jax.ShapeDtypeStruct((B, H), jnp.float32),              # dec_init_state
        ),
        in_specs=[smem, vmem, vmem, vmem, vmem, vmem, vmem],
        out_specs=(vmem, vmem, vmem),
    )(src_sents, packed["embedding"], packed["w_big"], packed["b_f"],
      packed["b_b"], packed["w_dec"], packed["b_dec"])

    return enc, (state[None, :, :], cell[None, :, :])


# ----------------------------------------------------------------------------------
# Pure-JAX reference (lax.scan LSTM, HIGHEST-precision matmuls) for correctness checks.
# ----------------------------------------------------------------------------------
def reference_forward(src_sents, params, residual=True):
    emb = jnp.take(params["embedding"], src_sents, axis=0)
    H = params["whh_f"].shape[0]
    B = emb.shape[1]
    dot = functools.partial(jnp.dot, precision=jax.lax.Precision.HIGHEST)

    def make_step(wih, whh, b):
        def step(carry, x):
            h, c = carry
            gates = dot(x, wih) + dot(h, whh) + b
            i = jax.nn.sigmoid(gates[:, :H])
            f = jax.nn.sigmoid(gates[:, H:2 * H])
            g = jnp.tanh(gates[:, 2 * H:3 * H])
            o = jax.nn.sigmoid(gates[:, 3 * H:])
            c_new = f * c + i * g
            h_new = o * jnp.tanh(c_new)
            return (h_new, c_new), h_new
        return step

    init = (jnp.zeros((B, H), jnp.float32), jnp.zeros((B, H), jnp.float32))
    (_, cf), out_f = jax.lax.scan(
        make_step(params["wih_f"], params["whh_f"], params["b_f"]), init, emb)
    (_, cb), out_b_rev = jax.lax.scan(
        make_step(params["wih_b"], params["whh_b"], params["b_b"]), init, emb[::-1])
    out_b = out_b_rev[::-1]
    enc_output = jnp.concatenate([out_f, out_b], axis=2)
    if residual:
        enc_output = enc_output + jnp.concatenate([emb, emb], axis=2)
    c_cat = jnp.concatenate([cf, cb], axis=1)
    cell = dot(c_cat, params["w_dec"]) + params["b_dec"]
    state = jnp.tanh(cell)
    return enc_output, (state[None], cell[None])


# ----------------------------------------------------------------------------------
# Deterministic synthetic parameter init (shapes from Encoder.__init__).
# ----------------------------------------------------------------------------------
def init_params(key, vocab_size, E, H, pad_idx=0):
    ks = jax.random.split(key, 8)

    def w(k, shape, scale=0.1):
        return jax.random.uniform(k, shape, jnp.float32, -scale, scale)

    emb = w(ks[0], (vocab_size, E))
    emb = emb.at[pad_idx].set(0.0)  # padding_idx row

    return dict(
        embedding=emb,
        # LSTM weights stored pre-transposed: (in, 4H)/(H, 4H); biases combined (1, 4H)
        # (= b_ih + b_hh when importing real PyTorch weights).
        wih_f=w(ks[1], (E, 4 * H)),
        whh_f=w(ks[2], (H, 4 * H)),
        b_f=w(ks[3], (1, 4 * H)),
        wih_b=w(ks[4], (E, 4 * H)),
        whh_b=w(ks[5], (H, 4 * H)),
        b_b=w(ks[6], (1, 4 * H)),
        # decoder_cell_init: Linear(2H -> H), stored transposed (2H, H).
        w_dec=w(ks[7], (2 * H, H)),
        b_dec=jnp.zeros((1, H), jnp.float32),
    )


if __name__ == "__main__":
    # args: an_vocab_size=50, embedding_size=32, hidden_size=32,
    #       bidirectional=True, layer_size=1, residual=True, drop_out=0.0
    T, B, E, H, V = 8, 2, 32, 32, 50

    key = jax.random.PRNGKey(0)
    pkey, skey = jax.random.split(key)
    raw = init_params(pkey, V, E, H)
    src_sents = jax.random.randint(skey, (T, B), 0, V, dtype=jnp.int32)

    ref_out, (ref_state, ref_cell) = reference_forward(src_sents, raw, residual=True)

    # f32 MXU path (tight check).
    packed_f32 = pack_params(raw, mxu_dtype=jnp.float32)
    enc_output, (dec_state, dec_cell) = jax.block_until_ready(
        encoder_forward(src_sents, packed_f32, residual=True))
    np.testing.assert_allclose(np.asarray(enc_output), np.asarray(ref_out),
                               atol=1e-3, rtol=1e-3)
    np.testing.assert_allclose(np.asarray(dec_cell), np.asarray(ref_cell),
                               atol=1e-3, rtol=1e-3)
    np.testing.assert_allclose(np.asarray(dec_state), np.asarray(ref_state),
                               atol=1e-3, rtol=1e-3)

    # Default bf16 MXU path (all generations; gate/state math stays f32), loose check.
    packed_bf16 = pack_params(raw)  # mxu_dtype=bf16 default
    enc_b, (st_b, cl_b) = jax.block_until_ready(
        encoder_forward(src_sents, packed_bf16, residual=True))
    np.testing.assert_allclose(np.asarray(enc_b), np.asarray(ref_out),
                               atol=5e-2, rtol=5e-2)
    np.testing.assert_allclose(np.asarray(cl_b), np.asarray(ref_cell),
                               atol=5e-2, rtol=5e-2)
    np.testing.assert_allclose(np.asarray(st_b), np.asarray(ref_state),
                               atol=5e-2, rtol=5e-2)

    print("KERNEL_OK")
</pallas_src>

<mosaic_0001>
module attributes {stable_mosaic.version = 11 : i64} {
  func.func @_encoder_kernel(%arg0: memref<8x2xi32, #tpu.memory_space<smem>>, %arg1: memref<50x1x32xf32, #tpu.memory_space<vmem>>, %arg2: memref<128x128xf32, #tpu.memory_space<vmem>>, %arg3: memref<1x128xf32, #tpu.memory_space<vmem>>, %arg4: memref<1x128xf32, #tpu.memory_space<vmem>>, %arg5: memref<64x32xf32, #tpu.memory_space<vmem>>, %arg6: memref<1x32xf32, #tpu.memory_space<vmem>>, %arg7: memref<8x2x64xf32, #tpu.memory_space<vmem>>, %arg8: memref<2x32xf32, #tpu.memory_space<vmem>>, %arg9: memref<2x32xf32, #tpu.memory_space<vmem>>) attributes {dimension_semantics = [], scalar_prefetch = 0 : i64, scratch_operands = 0 : i64, tpu.core_type = #tpu.core_type<tc>} {
    %c0 = arith.constant 0 : index
    %c0_0 = arith.constant 0 : index
    %0 = vector.load %arg2[%c0, %c0_0] : memref<128x128xf32, #tpu.memory_space<vmem>>, vector<128x128xf32>
    %c0_1 = arith.constant 0 : index
    %c0_2 = arith.constant 0 : index
    %1 = vector.load %arg5[%c0_1, %c0_2] : memref<64x32xf32, #tpu.memory_space<vmem>>, vector<64x32xf32>
    %c0_3 = arith.constant 0 : index
    %c0_4 = arith.constant 0 : index
    %2 = vector.load %arg6[%c0_3, %c0_4] : memref<1x32xf32, #tpu.memory_space<vmem>>, vector<1x32xf32>
    %c0_5 = arith.constant 0 : index
    %c0_6 = arith.constant 0 : index
    %3 = vector.load %arg3[%c0_5, %c0_6] : memref<1x128xf32, #tpu.memory_space<vmem>>, vector<1x128xf32>
    %4 = vector.shape_cast %3 : vector<1x128xf32> to vector<1x128xf32>
    %5 = vector.broadcast %4 : vector<1x128xf32> to vector<2x128xf32>
    %c0_7 = arith.constant 0 : index
    %c0_8 = arith.constant 0 : index
    %6 = vector.load %arg4[%c0_7, %c0_8] : memref<1x128xf32, #tpu.memory_space<vmem>>, vector<1x128xf32>
    %7 = vector.shape_cast %6 : vector<1x128xf32> to vector<1x128xf32>
    %8 = vector.broadcast %7 : vector<1x128xf32> to vector<2x128xf32>
    %9 = tpu.concatenate %5, %8 in 0 : vector<2x128xf32>, vector<2x128xf32> -> vector<4x128xf32>
    %cst = arith.constant 0.000000e+00 : f32
    %10 = vector.broadcast %cst : f32 to vector<2x64xf32>
    %cst_9 = arith.constant 0.000000e+00 : f32
    %11 = vector.broadcast %cst_9 : f32 to vector<4x32xf32>
    %c0_i32 = arith.constant 0 : i32
    %c7_i32 = arith.constant 7 : i32
    %12 = arith.subi %c7_i32, %c0_i32 : i32
    %13 = arith.index_cast %c0_i32 : i32 to index
    %c0_10 = arith.constant 0 : index
    %14 = memref.load %arg0[%13, %c0_10] : memref<8x2xi32, #tpu.memory_space<smem>>
    %15 = arith.index_cast %14 : i32 to index
    %c0_11 = arith.constant 0 : index
    %c0_12 = arith.constant 0 : index
    %16 = vector.load %arg1[%15, %c0_11, %c0_12] : memref<50x1x32xf32, #tpu.memory_space<vmem>>, vector<1x1x32xf32>
    %17 = vector.shape_cast %16 : vector<1x1x32xf32> to vector<1x32xf32>
    %18 = arith.index_cast %c0_i32 : i32 to index
    %c1 = arith.constant 1 : index
    %19 = memref.load %arg0[%18, %c1] : memref<8x2xi32, #tpu.memory_space<smem>>
    %20 = arith.index_cast %19 : i32 to index
    %c0_13 = arith.constant 0 : index
    %c0_14 = arith.constant 0 : index
    %21 = vector.load %arg1[%20, %c0_13, %c0_14] : memref<50x1x32xf32, #tpu.memory_space<vmem>>, vector<1x1x32xf32>
    %22 = vector.shape_cast %21 : vector<1x1x32xf32> to vector<1x32xf32>
    %23 = tpu.concatenate %17, %22 in 0 : vector<1x32xf32>, vector<1x32xf32> -> vector<2x32xf32>
    %24 = arith.index_cast %12 : i32 to index
    %c0_15 = arith.constant 0 : index
    %25 = memref.load %arg0[%24, %c0_15] : memref<8x2xi32, #tpu.memory_space<smem>>
    %26 = arith.index_cast %25 : i32 to index
    %c0_16 = arith.constant 0 : index
    %c0_17 = arith.constant 0 : index
    %27 = vector.load %arg1[%26, %c0_16, %c0_17] : memref<50x1x32xf32, #tpu.memory_space<vmem>>, vector<1x1x32xf32>
    %28 = vector.shape_cast %27 : vector<1x1x32xf32> to vector<1x32xf32>
    %29 = arith.index_cast %12 : i32 to index
    %c1_18 = arith.constant 1 : index
    %30 = memref.load %arg0[%29, %c1_18] : memref<8x2xi32, #tpu.memory_space<smem>>
    %31 = arith.index_cast %30 : i32 to index
    %c0_19 = arith.constant 0 : index
    %c0_20 = arith.constant 0 : index
    %32 = vector.load %arg1[%31, %c0_19, %c0_20] : memref<50x1x32xf32, #tpu.memory_space<vmem>>, vector<1x1x32xf32>
    %33 = vector.shape_cast %32 : vector<1x1x32xf32> to vector<1x32xf32>
    %34 = tpu.concatenate %28, %33 in 0 : vector<1x32xf32>, vector<1x32xf32> -> vector<2x32xf32>
    %35 = vector.extract_strided_slice %11 {offsets = [0, 0], sizes = [2, 32], strides = [1, 1]} : vector<4x32xf32> to vector<2x32xf32>
    %36 = tpu.concatenate %23, %35 in 1 : vector<2x32xf32>, vector<2x32xf32> -> vector<2x64xf32>
    %37 = vector.extract_strided_slice %11 {offsets = [2, 0], sizes = [2, 32], strides = [1, 1]} : vector<4x32xf32> to vector<2x32xf32>
    %38 = tpu.concatenate %34, %37 in 1 : vector<2x32xf32>, vector<2x32xf32> -> vector<2x64xf32>
    %39 = tpu.concatenate %36, %10 in 1 : vector<2x64xf32>, vector<2x64xf32> -> vector<2x128xf32>
    %40 = tpu.concatenate %10, %38 in 1 : vector<2x64xf32>, vector<2x64xf32> -> vector<2x128xf32>
    %41 = tpu.concatenate %39, %40 in 0 : vector<2x128xf32>, vector<2x128xf32> -> vector<4x128xf32>
    %cst_21 = arith.constant dense<0.000000e+00> : vector<4x128xf32>
    %42 = tpu.matmul %41, %0, %cst_21 {dimension_numbers = #tpu.dot_dimension_numbers<[1], [0], [0], [1], [0, 0, 1, 1], [], []>} : vector<4x128xf32>, vector<128x128xf32>, vector<4x128xf32> -> vector<4x128xf32>
    %43 = arith.addf %42, %9 : vector<4x128xf32>
    %44 = arith.negf %43 : vector<4x128xf32>
    %45 = math.exp %44 : vector<4x128xf32>
    %cst_22 = arith.constant 1.000000e+00 : f32
    %46 = vector.broadcast %cst_22 : f32 to vector<4x128xf32>
    %47 = arith.addf %46, %45 : vector<4x128xf32>
    %48 = arith.divf %46, %47 : vector<4x128xf32>
    %49 = vector.extract_strided_slice %43 {offsets = [0, 64], sizes = [4, 32], strides = [1, 1]} : vector<4x128xf32> to vector<4x32xf32>
    %50 = math.tanh %49 : vector<4x32xf32>
    %51 = vector.extract_strided_slice %48 {offsets = [0, 0], sizes = [4, 32], strides = [1, 1]} : vector<4x128xf32> to vector<4x32xf32>
    %52 = vector.extract_strided_slice %48 {offsets = [0, 32], sizes = [4, 32], strides = [1, 1]} : vector<4x128xf32> to vector<4x32xf32>
    %53 = vector.extract_strided_slice %48 {offsets = [0, 96], sizes = [4, 32], strides = [1, 1]} : vector<4x128xf32> to vector<4x32xf32>
    %54 = arith.mulf %52, %11 : vector<4x32xf32>
    %55 = arith.mulf %51, %50 : vector<4x32xf32>
    %56 = arith.addf %54, %55 : vector<4x32xf32>
    %57 = math.tanh %56 : vector<4x32xf32>
    %58 = arith.mulf %53, %57 : vector<4x32xf32>
    %59 = tpu.concatenate %23, %34 in 0 : vector<2x32xf32>, vector<2x32xf32> -> vector<4x32xf32>
    %60 = arith.addf %58, %59 : vector<4x32xf32>
    %61 = vector.extract_strided_slice %60 {offsets = [0, 0], sizes = [2, 32], strides = [1, 1]} : vector<4x32xf32> to vector<2x32xf32>
    %62 = arith.index_cast %c0_i32 : i32 to index
    %c0_23 = arith.constant 0 : index
    %c0_24 = arith.constant 0 : index
    %63 = vector.load %arg7[%62, %c0_23, %c0_24] : memref<8x2x64xf32, #tpu.memory_space<vmem>>, vector<1x2x32xf32>
    %64 = vector.shape_cast %63 : vector<1x2x32xf32> to vector<2x32xf32>
    %65 = vector.shape_cast %61 : vector<2x32xf32> to vector<1x2x32xf32>
    tpu.vector_store %arg7[%62, %c0_23, %c0_24], %65 {strides = array<i32>} : memref<8x2x64xf32, #tpu.memory_space<vmem>>, vector<1x2x32xf32>,
    %66 = vector.extract_strided_slice %60 {offsets = [2, 0], sizes = [2, 32], strides = [1, 1]} : vector<4x32xf32> to vector<2x32xf32>
    %67 = arith.index_cast %12 : i32 to index
    %c0_25 = arith.constant 0 : index
    %c32 = arith.constant 32 : index
    %68 = vector.load %arg7[%67, %c0_25, %c32] : memref<8x2x64xf32, #tpu.memory_space<vmem>>, vector<1x2x32xf32>
    %69 = vector.shape_cast %68 : vector<1x2x32xf32> to vector<2x32xf32>
    %70 = vector.shape_cast %66 : vector<2x32xf32> to vector<1x2x32xf32>
    tpu.vector_store %arg7[%67, %c0_25, %c32], %70 {strides = array<i32>} : memref<8x2x64xf32, #tpu.memory_space<vmem>>, vector<1x2x32xf32>,
    %c1_i32 = arith.constant 1 : i32
    %c7_i32_26 = arith.constant 7 : i32
    %71 = arith.subi %c7_i32_26, %c1_i32 : i32
    %72 = arith.index_cast %c1_i32 : i32 to index
    %c0_27 = arith.constant 0 : index
    %73 = memref.load %arg0[%72, %c0_27] : memref<8x2xi32, #tpu.memory_space<smem>>
    %74 = arith.index_cast %73 : i32 to index
    %c0_28 = arith.constant 0 : index
    %c0_29 = arith.constant 0 : index
    %75 = vector.load %arg1[%74, %c0_28, %c0_29] : memref<50x1x32xf32, #tpu.memory_space<vmem>>, vector<1x1x32xf32>
    %76 = vector.shape_cast %75 : vector<1x1x32xf32> to vector<1x32xf32>
    %77 = arith.index_cast %c1_i32 : i32 to index
    %c1_30 = arith.constant 1 : index
    %78 = memref.load %arg0[%77, %c1_30] : memref<8x2xi32, #tpu.memory_space<smem>>
    %79 = arith.index_cast %78 : i32 to index
    %c0_31 = arith.constant 0 : index
    %c0_32 = arith.constant 0 : index
    %80 = vector.load %arg1[%79, %c0_31, %c0_32] : memref<50x1x32xf32, #tpu.memory_space<vmem>>, vector<1x1x32xf32>
    %81 = vector.shape_cast %80 : vector<1x1x32xf32> to vector<1x32xf32>
    %82 = tpu.concatenate %76, %81 in 0 : vector<1x32xf32>, vector<1x32xf32> -> vector<2x32xf32>
    %83 = arith.index_cast %71 : i32 to index
    %c0_33 = arith.constant 0 : index
    %84 = memref.load %arg0[%83, %c0_33] : memref<8x2xi32, #tpu.memory_space<smem>>
    %85 = arith.index_cast %84 : i32 to index
    %c0_34 = arith.constant 0 : index
    %c0_35 = arith.constant 0 : index
    %86 = vector.load %arg1[%85, %c0_34, %c0_35] : memref<50x1x32xf32, #tpu.memory_space<vmem>>, vector<1x1x32xf32>
    %87 = vector.shape_cast %86 : vector<1x1x32xf32> to vector<1x32xf32>
    %88 = arith.index_cast %71 : i32 to index
    %c1_36 = arith.constant 1 : index
    %89 = memref.load %arg0[%88, %c1_36] : memref<8x2xi32, #tpu.memory_space<smem>>
    %90 = arith.index_cast %89 : i32 to index
    %c0_37 = arith.constant 0 : index
    %c0_38 = arith.constant 0 : index
    %91 = vector.load %arg1[%90, %c0_37, %c0_38] : memref<50x1x32xf32, #tpu.memory_space<vmem>>, vector<1x1x32xf32>
    %92 = vector.shape_cast %91 : vector<1x1x32xf32> to vector<1x32xf32>
    %93 = tpu.concatenate %87, %92 in 0 : vector<1x32xf32>, vector<1x32xf32> -> vector<2x32xf32>
    %94 = vector.extract_strided_slice %58 {offsets = [0, 0], sizes = [2, 32], strides = [1, 1]} : vector<4x32xf32> to vector<2x32xf32>
    %95 = tpu.concatenate %82, %94 in 1 : vector<2x32xf32>, vector<2x32xf32> -> vector<2x64xf32>
    %96 = vector.extract_strided_slice %58 {offsets = [2, 0], sizes = [2, 32], strides = [1, 1]} : vector<4x32xf32> to vector<2x32xf32>
    %97 = tpu.concatenate %93, %96 in 1 : vector<2x32xf32>, vector<2x32xf32> -> vector<2x64xf32>
    %98 = tpu.concatenate %95, %10 in 1 : vector<2x64xf32>, vector<2x64xf32> -> vector<2x128xf32>
    %99 = tpu.concatenate %10, %97 in 1 : vector<2x64xf32>, vector<2x64xf32> -> vector<2x128xf32>
    %100 = tpu.concatenate %98, %99 in 0 : vector<2x128xf32>, vector<2x128xf32> -> vector<4x128xf32>
    %cst_39 = arith.constant dense<0.000000e+00> : vector<4x128xf32>
    %101 = tpu.matmul %100, %0, %cst_39 {dimension_numbers = #tpu.dot_dimension_numbers<[1], [0], [0], [1], [0, 0, 1, 1], [], []>} : vector<4x128xf32>, vector<128x128xf32>, vector<4x128xf32> -> vector<4x128xf32>
    %102 = arith.addf %101, %9 : vector<4x128xf32>
    %103 = arith.negf %102 : vector<4x128xf32>
    %104 = math.exp %103 : vector<4x128xf32>
    %cst_40 = arith.constant 1.000000e+00 : f32
    %105 = vector.broadcast %cst_40 : f32 to vector<4x128xf32>
    %106 = arith.addf %105, %104 : vector<4x128xf32>
    %107 = arith.divf %105, %106 : vector<4x128xf32>
    %108 = vector.extract_strided_slice %102 {offsets = [0, 64], sizes = [4, 32], strides = [1, 1]} : vector<4x128xf32> to vector<4x32xf32>
    %109 = math.tanh %108 : vector<4x32xf32>
    %110 = vector.extract_strided_slice %107 {offsets = [0, 0], sizes = [4, 32], strides = [1, 1]} : vector<4x128xf32> to vector<4x32xf32>
    %111 = vector.extract_strided_slice %107 {offsets = [0, 32], sizes = [4, 32], strides = [1, 1]} : vector<4x128xf32> to vector<4x32xf32>
    %112 = vector.extract_strided_slice %107 {offsets = [0, 96], sizes = [4, 32], strides = [1, 1]} : vector<4x128xf32> to vector<4x32xf32>
    %113 = arith.mulf %111, %56 : vector<4x32xf32>
    %114 = arith.mulf %110, %109 : vector<4x32xf32>
    %115 = arith.addf %113, %114 : vector<4x32xf32>
    %116 = math.tanh %115 : vector<4x32xf32>
    %117 = arith.mulf %112, %116 : vector<4x32xf32>
    %118 = tpu.concatenate %82, %93 in 0 : vector<2x32xf32>, vector<2x32xf32> -> vector<4x32xf32>
    %119 = arith.addf %117, %118 : vector<4x32xf32>
    %120 = vector.extract_strided_slice %119 {offsets = [0, 0], sizes = [2, 32], strides = [1, 1]} : vector<4x32xf32> to vector<2x32xf32>
    %121 = arith.index_cast %c1_i32 : i32 to index
    %c0_41 = arith.constant 0 : index
    %c0_42 = arith.constant 0 : index
    %122 = vector.load %arg7[%121, %c0_41, %c0_42] : memref<8x2x64xf32, #tpu.memory_space<vmem>>, vector<1x2x32xf32>
    %123 = vector.shape_cast %122 : vector<1x2x32xf32> to vector<2x32xf32>
    %124 = vector.shape_cast %120 : vector<2x32xf32> to vector<1x2x32xf32>
    tpu.vector_store %arg7[%121, %c0_41, %c0_42], %124 {strides = array<i32>} : memref<8x2x64xf32, #tpu.memory_space<vmem>>, vector<1x2x32xf32>,
    %125 = vector.extract_strided_slice %119 {offsets = [2, 0], sizes = [2, 32], strides = [1, 1]} : vector<4x32xf32> to vector<2x32xf32>
    %126 = arith.index_cast %71 : i32 to index
    %c0_43 = arith.constant 0 : index
    %c32_44 = arith.constant 32 : index
    %127 = vector.load %arg7[%126, %c0_43, %c32_44] : memref<8x2x64xf32, #tpu.memory_space<vmem>>, vector<1x2x32xf32>
    %128 = vector.shape_cast %127 : vector<1x2x32xf32> to vector<2x32xf32>
    %129 = vector.shape_cast %125 : vector<2x32xf32> to vector<1x2x32xf32>
    tpu.vector_store %arg7[%126, %c0_43, %c32_44], %129 {strides = array<i32>} : memref<8x2x64xf32, #tpu.memory_space<vmem>>, vector<1x2x32xf32>,
    %c2_i32 = arith.constant 2 : i32
    %c7_i32_45 = arith.constant 7 : i32
    %130 = arith.subi %c7_i32_45, %c2_i32 : i32
    %131 = arith.index_cast %c2_i32 : i32 to index
    %c0_46 = arith.constant 0 : index
    %132 = memref.load %arg0[%131, %c0_46] : memref<8x2xi32, #tpu.memory_space<smem>>
    %133 = arith.index_cast %132 : i32 to index
    %c0_47 = arith.constant 0 : index
    %c0_48 = arith.constant 0 : index
    %134 = vector.load %arg1[%133, %c0_47, %c0_48] : memref<50x1x32xf32, #tpu.memory_space<vmem>>, vector<1x1x32xf32>
    %135 = vector.shape_cast %134 : vector<1x1x32xf32> to vector<1x32xf32>
    %136 = arith.index_cast %c2_i32 : i32 to index
    %c1_49 = arith.constant 1 : index
    %137 = memref.load %arg0[%136, %c1_49] : memref<8x2xi32, #tpu.memory_space<smem>>
    %138 = arith.index_cast %137 : i32 to index
    %c0_50 = arith.constant 0 : index
    %c0_51 = arith.constant 0 : index
    %139 = vector.load %arg1[%138, %c0_50, %c0_51] : memref<50x1x32xf32, #tpu.memory_space<vmem>>, vector<1x1x32xf32>
    %140 = vector.shape_cast %139 : vector<1x1x32xf32> to vector<1x32xf32>
    %141 = tpu.concatenate %135, %140 in 0 : vector<1x32xf32>, vector<1x32xf32> -> vector<2x32xf32>
    %142 = arith.index_cast %130 : i32 to index
    %c0_52 = arith.constant 0 : index
    %143 = memref.load %arg0[%142, %c0_52] : memref<8x2xi32, #tpu.memory_space<smem>>
    %144 = arith.index_cast %143 : i32 to index
    %c0_53 = arith.constant 0 : index
    %c0_54 = arith.constant 0 : index
    %145 = vector.load %arg1[%144, %c0_53, %c0_54] : memref<50x1x32xf32, #tpu.memory_space<vmem>>, vector<1x1x32xf32>
    %146 = vector.shape_cast %145 : vector<1x1x32xf32> to vector<1x32xf32>
    %147 = arith.index_cast %130 : i32 to index
    %c1_55 = arith.constant 1 : index
    %148 = memref.load %arg0[%147, %c1_55] : memref<8x2xi32, #tpu.memory_space<smem>>
    %149 = arith.index_cast %148 : i32 to index
    %c0_56 = arith.constant 0 : index
    %c0_57 = arith.constant 0 : index
    %150 = vector.load %arg1[%149, %c0_56, %c0_57] : memref<50x1x32xf32, #tpu.memory_space<vmem>>, vector<1x1x32xf32>
    %151 = vector.shape_cast %150 : vector<1x1x32xf32> to vector<1x32xf32>
    %152 = tpu.concatenate %146, %151 in 0 : vector<1x32xf32>, vector<1x32xf32> -> vector<2x32xf32>
    %153 = vector.extract_strided_slice %117 {offsets = [0, 0], sizes = [2, 32], strides = [1, 1]} : vector<4x32xf32> to vector<2x32xf32>
    %154 = tpu.concatenate %141, %153 in 1 : vector<2x32xf32>, vector<2x32xf32> -> vector<2x64xf32>
    %155 = vector.extract_strided_slice %117 {offsets = [2, 0], sizes = [2, 32], strides = [1, 1]} : vector<4x32xf32> to vector<2x32xf32>
    %156 = tpu.concatenate %152, %155 in 1 : vector<2x32xf32>, vector<2x32xf32> -> vector<2x64xf32>
    %157 = tpu.concatenate %154, %10 in 1 : vector<2x64xf32>, vector<2x64xf32> -> vector<2x128xf32>
    %158 = tpu.concatenate %10, %156 in 1 : vector<2x64xf32>, vector<2x64xf32> -> vector<2x128xf32>
    %159 = tpu.concatenate %157, %158 in 0 : vector<2x128xf32>, vector<2x128xf32> -> vector<4x128xf32>
    %cst_58 = arith.constant dense<0.000000e+00> : vector<4x128xf32>
    %160 = tpu.matmul %159, %0, %cst_58 {dimension_numbers = #tpu.dot_dimension_numbers<[1], [0], [0], [1], [0, 0, 1, 1], [], []>} : vector<4x128xf32>, vector<128x128xf32>, vector<4x128xf32> -> vector<4x128xf32>
    %161 = arith.addf %160, %9 : vector<4x128xf32>
    %162 = arith.negf %161 : vector<4x128xf32>
    %163 = math.exp %162 : vector<4x128xf32>
    %cst_59 = arith.constant 1.000000e+00 : f32
    %164 = vector.broadcast %cst_59 : f32 to vector<4x128xf32>
    %165 = arith.addf %164, %163 : vector<4x128xf32>
    %166 = arith.divf %164, %165 : vector<4x128xf32>
    %167 = vector.extract_strided_slice %161 {offsets = [0, 64], sizes = [4, 32], strides = [1, 1]} : vector<4x128xf32> to vector<4x32xf32>
    %168 = math.tanh %167 : vector<4x32xf32>
    %169 = vector.extract_strided_slice %166 {offsets = [0, 0], sizes = [4, 32], strides = [1, 1]} : vector<4x128xf32> to vector<4x32xf32>
    %170 = vector.extract_strided_slice %166 {offsets = [0, 32], sizes = [4, 32], strides = [1, 1]} : vector<4x128xf32> to vector<4x32xf32>
    %171 = vector.extract_strided_slice %166 {offsets = [0, 96], sizes = [4, 32], strides = [1, 1]} : vector<4x128xf32> to vector<4x32xf32>
    %172 = arith.mulf %170, %115 : vector<4x32xf32>
    %173 = arith.mulf %169, %168 : vector<4x32xf32>
    %174 = arith.addf %172, %173 : vector<4x32xf32>
    %175 = math.tanh %174 : vector<4x32xf32>
    %176 = arith.mulf %171, %175 : vector<4x32xf32>
    %177 = tpu.concatenate %141, %152 in 0 : vector<2x32xf32>, vector<2x32xf32> -> vector<4x32xf32>
    %178 = arith.addf %176, %177 : vector<4x32xf32>
    %179 = vector.extract_strided_slice %178 {offsets = [0, 0], sizes = [2, 32], strides = [1, 1]} : vector<4x32xf32> to vector<2x32xf32>
    %180 = arith.index_cast %c2_i32 : i32 to index
    %c0_60 = arith.constant 0 : index
    %c0_61 = arith.constant 0 : index
    %181 = vector.load %arg7[%180, %c0_60, %c0_61] : memref<8x2x64xf32, #tpu.memory_space<vmem>>, vector<1x2x32xf32>
    %182 = vector.shape_cast %181 : vector<1x2x32xf32> to vector<2x32xf32>
    %183 = vector.shape_cast %179 : vector<2x32xf32> to vector<1x2x32xf32>
    tpu.vector_store %arg7[%180, %c0_60, %c0_61], %183 {strides = array<i32>} : memref<8x2x64xf32, #tpu.memory_space<vmem>>, vector<1x2x32xf32>,
    %184 = vector.extract_strided_slice %178 {offsets = [2, 0], sizes = [2, 32], strides = [1, 1]} : vector<4x32xf32> to vector<2x32xf32>
    %185 = arith.index_cast %130 : i32 to index
    %c0_62 = arith.constant 0 : index
    %c32_63 = arith.constant 32 : index
    %186 = vector.load %arg7[%185, %c0_62, %c32_63] : memref<8x2x64xf32, #tpu.memory_space<vmem>>, vector<1x2x32xf32>
    %187 = vector.shape_cast %186 : vector<1x2x32xf32> to vector<2x32xf32>
    %188 = vector.shape_cast %184 : vector<2x32xf32> to vector<1x2x32xf32>
    tpu.vector_store %arg7[%185, %c0_62, %c32_63], %188 {strides = array<i32>} : memref<8x2x64xf32, #tpu.memory_space<vmem>>, vector<1x2x32xf32>,
    %c3_i32 = arith.constant 3 : i32
    %c7_i32_64 = arith.constant 7 : i32
    %189 = arith.subi %c7_i32_64, %c3_i32 : i32
    %190 = arith.index_cast %c3_i32 : i32 to index
    %c0_65 = arith.constant 0 : index
    %191 = memref.load %arg0[%190, %c0_65] : memref<8x2xi32, #tpu.memory_space<smem>>
    %192 = arith.index_cast %191 : i32 to index
    %c0_66 = arith.constant 0 : index
    %c0_67 = arith.constant 0 : index
    %193 = vector.load %arg1[%192, %c0_66, %c0_67] : memref<50x1x32xf32, #tpu.memory_space<vmem>>, vector<1x1x32xf32>
    %194 = vector.shape_cast %193 : vector<1x1x32xf32> to vector<1x32xf32>
    %195 = arith.index_cast %c3_i32 : i32 to index
    %c1_68 = arith.constant 1 : index
    %196 = memref.load %arg0[%195, %c1_68] : memref<8x2xi32, #tpu.memory_space<smem>>
    %197 = arith.index_cast %196 : i32 to index
    %c0_69 = arith.constant 0 : index
    %c0_70 = arith.constant 0 : index
    %198 = vector.load %arg1[%197, %c0_69, %c0_70] : memref<50x1x32xf32, #tpu.memory_space<vmem>>, vector<1x1x32xf32>
    %199 = vector.shape_cast %198 : vector<1x1x32xf32> to vector<1x32xf32>
    %200 = tpu.concatenate %194, %199 in 0 : vector<1x32xf32>, vector<1x32xf32> -> vector<2x32xf32>
    %201 = arith.index_cast %189 : i32 to index
    %c0_71 = arith.constant 0 : index
    %202 = memref.load %arg0[%201, %c0_71] : memref<8x2xi32, #tpu.memory_space<smem>>
    %203 = arith.index_cast %202 : i32 to index
    %c0_72 = arith.constant 0 : index
    %c0_73 = arith.constant 0 : index
    %204 = vector.load %arg1[%203, %c0_72, %c0_73] : memref<50x1x32xf32, #tpu.memory_space<vmem>>, vector<1x1x32xf32>
    %205 = vector.shape_cast %204 : vector<1x1x32xf32> to vector<1x32xf32>
    %206 = arith.index_cast %189 : i32 to index
    %c1_74 = arith.constant 1 : index
    %207 = memref.load %arg0[%206, %c1_74] : memref<8x2xi32, #tpu.memory_space<smem>>
    %208 = arith.index_cast %207 : i32 to index
    %c0_75 = arith.constant 0 : index
    %c0_76 = arith.constant 0 : index
    %209 = vector.load %arg1[%208, %c0_75, %c0_76] : memref<50x1x32xf32, #tpu.memory_space<vmem>>, vector<1x1x32xf32>
    %210 = vector.shape_cast %209 : vector<1x1x32xf32> to vector<1x32xf32>
    %211 = tpu.concatenate %205, %210 in 0 : vector<1x32xf32>, vector<1x32xf32> -> vector<2x32xf32>
    %212 = vector.extract_strided_slice %176 {offsets = [0, 0], sizes = [2, 32], strides = [1, 1]} : vector<4x32xf32> to vector<2x32xf32>
    %213 = tpu.concatenate %200, %212 in 1 : vector<2x32xf32>, vector<2x32xf32> -> vector<2x64xf32>
    %214 = vector.extract_strided_slice %176 {offsets = [2, 0], sizes = [2, 32], strides = [1, 1]} : vector<4x32xf32> to vector<2x32xf32>
    %215 = tpu.concatenate %211, %214 in 1 : vector<2x32xf32>, vector<2x32xf32> -> vector<2x64xf32>
    %216 = tpu.concatenate %213, %10 in 1 : vector<2x64xf32>, vector<2x64xf32> -> vector<2x128xf32>
    %217 = tpu.concatenate %10, %215 in 1 : vector<2x64xf32>, vector<2x64xf32> -> vector<2x128xf32>
    %218 = tpu.concatenate %216, %217 in 0 : vector<2x128xf32>, vector<2x128xf32> -> vector<4x128xf32>
    %cst_77 = arith.constant dense<0.000000e+00> : vector<4x128xf32>
    %219 = tpu.matmul %218, %0, %cst_77 {dimension_numbers = #tpu.dot_dimension_numbers<[1], [0], [0], [1], [0, 0, 1, 1], [], []>} : vector<4x128xf32>, vector<128x128xf32>, vector<4x128xf32> -> vector<4x128xf32>
    %220 = arith.addf %219, %9 : vector<4x128xf32>
    %221 = arith.negf %220 : vector<4x128xf32>
    %222 = math.exp %221 : vector<4x128xf32>
    %cst_78 = arith.constant 1.000000e+00 : f32
    %223 = vector.broadcast %cst_78 : f32 to vector<4x128xf32>
    %224 = arith.addf %223, %222 : vector<4x128xf32>
    %225 = arith.divf %223, %224 : vector<4x128xf32>
    %226 = vector.extract_strided_slice %220 {offsets = [0, 64], sizes = [4, 32], strides = [1, 1]} : vector<4x128xf32> to vector<4x32xf32>
    %227 = math.tanh %226 : vector<4x32xf32>
    %228 = vector.extract_strided_slice %225 {offsets = [0, 0], sizes = [4, 32], strides = [1, 1]} : vector<4x128xf32> to vector<4x32xf32>
    %229 = vector.extract_strided_slice %225 {offsets = [0, 32], sizes = [4, 32], strides = [1, 1]} : vector<4x128xf32> to vector<4x32xf32>
    %230 = vector.extract_strided_slice %225 {offsets = [0, 96], sizes = [4, 32], strides = [1, 1]} : vector<4x128xf32> to vector<4x32xf32>
    %231 = arith.mulf %229, %174 : vector<4x32xf32>
    %232 = arith.mulf %228, %227 : vector<4x32xf32>
    %233 = arith.addf %231, %232 : vector<4x32xf32>
    %234 = math.tanh %233 : vector<4x32xf32>
    %235 = arith.mulf %230, %234 : vector<4x32xf32>
    %236 = tpu.concatenate %200, %211 in 0 : vector<2x32xf32>, vector<2x32xf32> -> vector<4x32xf32>
    %237 = arith.addf %235, %236 : vector<4x32xf32>
    %238 = vector.extract_strided_slice %237 {offsets = [0, 0], sizes = [2, 32], strides = [1, 1]} : vector<4x32xf32> to vector<2x32xf32>
    %239 = arith.index_cast %c3_i32 : i32 to index
    %c0_79 = arith.constant 0 : index
    %c0_80 = arith.constant 0 : index
    %240 = vector.load %arg7[%239, %c0_79, %c0_80] : memref<8x2x64xf32, #tpu.memory_space<vmem>>, vector<1x2x32xf32>
    %241 = vector.shape_cast %240 : vector<1x2x32xf32> to vector<2x32xf32>
    %242 = vector.shape_cast %238 : vector<2x32xf32> to vector<1x2x32xf32>
    tpu.vector_store %arg7[%239, %c0_79, %c0_80], %242 {strides = array<i32>} : memref<8x2x64xf32, #tpu.memory_space<vmem>>, vector<1x2x32xf32>,
    %243 = vector.extract_strided_slice %237 {offsets = [2, 0], sizes = [2, 32], strides = [1, 1]} : vector<4x32xf32> to vector<2x32xf32>
    %244 = arith.index_cast %189 : i32 to index
    %c0_81 = arith.constant 0 : index
    %c32_82 = arith.constant 32 : index
    %245 = vector.load %arg7[%244, %c0_81, %c32_82] : memref<8x2x64xf32, #tpu.memory_space<vmem>>, vector<1x2x32xf32>
    %246 = vector.shape_cast %245 : vector<1x2x32xf32> to vector<2x32xf32>
    %247 = vector.shape_cast %243 : vector<2x32xf32> to vector<1x2x32xf32>
    tpu.vector_store %arg7[%244, %c0_81, %c32_82], %247 {strides = array<i32>} : memref<8x2x64xf32, #tpu.memory_space<vmem>>, vector<1x2x32xf32>,
    %c4_i32 = arith.constant 4 : i32
    %c7_i32_83 = arith.constant 7 : i32
    %248 = arith.subi %c7_i32_83, %c4_i32 : i32
    %249 = arith.index_cast %c4_i32 : i32 to index
    %c0_84 = arith.constant 0 : index
    %250 = memref.load %arg0[%249, %c0_84] : memref<8x2xi32, #tpu.memory_space<smem>>
    %251 = arith.index_cast %250 : i32 to index
    %c0_85 = arith.constant 0 : index
    %c0_86 = arith.constant 0 : index
    %252 = vector.load %arg1[%251, %c0_85, %c0_86] : memref<50x1x32xf32, #tpu.memory_space<vmem>>, vector<1x1x32xf32>
    %253 = vector.shape_cast %252 : vector<1x1x32xf32> to vector<1x32xf32>
    %254 = arith.index_cast %c4_i32 : i32 to index
    %c1_87 = arith.constant 1 : index
    %255 = memref.load %arg0[%254, %c1_87] : memref<8x2xi32, #tpu.memory_space<smem>>
    %256 = arith.index_cast %255 : i32 to index
    %c0_88 = arith.constant 0 : index
    %c0_89 = arith.constant 0 : index
    %257 = vector.load %arg1[%256, %c0_88, %c0_89] : memref<50x1x32xf32, #tpu.memory_space<vmem>>, vector<1x1x32xf32>
    %258 = vector.shape_cast %257 : vector<1x1x32xf32> to vector<1x32xf32>
    %259 = tpu.concatenate %253, %258 in 0 : vector<1x32xf32>, vector<1x32xf32> -> vector<2x32xf32>
    %260 = arith.index_cast %248 : i32 to index
    %c0_90 = arith.constant 0 : index
    %261 = memref.load %arg0[%260, %c0_90] : memref<8x2xi32, #tpu.memory_space<smem>>
    %262 = arith.index_cast %261 : i32 to index
    %c0_91 = arith.constant 0 : index
    %c0_92 = arith.constant 0 : index
    %263 = vector.load %arg1[%262, %c0_91, %c0_92] : memref<50x1x32xf32, #tpu.memory_space<vmem>>, vector<1x1x32xf32>
    %264 = vector.shape_cast %263 : vector<1x1x32xf32> to vector<1x32xf32>
    %265 = arith.index_cast %248 : i32 to index
    %c1_93 = arith.constant 1 : index
    %266 = memref.load %arg0[%265, %c1_93] : memref<8x2xi32, #tpu.memory_space<smem>>
    %267 = arith.index_cast %266 : i32 to index
    %c0_94 = arith.constant 0 : index
    %c0_95 = arith.constant 0 : index
    %268 = vector.load %arg1[%267, %c0_94, %c0_95] : memref<50x1x32xf32, #tpu.memory_space<vmem>>, vector<1x1x32xf32>
    %269 = vector.shape_cast %268 : vector<1x1x32xf32> to vector<1x32xf32>
    %270 = tpu.concatenate %264, %269 in 0 : vector<1x32xf32>, vector<1x32xf32> -> vector<2x32xf32>
    %271 = vector.extract_strided_slice %235 {offsets = [0, 0], sizes = [2, 32], strides = [1, 1]} : vector<4x32xf32> to vector<2x32xf32>
    %272 = tpu.concatenate %259, %271 in 1 : vector<2x32xf32>, vector<2x32xf32> -> vector<2x64xf32>
    %273 = vector.extract_strided_slice %235 {offsets = [2, 0], sizes = [2, 32], strides = [1, 1]} : vector<4x32xf32> to vector<2x32xf32>
    %274 = tpu.concatenate %270, %273 in 1 : vector<2x32xf32>, vector<2x32xf32> -> vector<2x64xf32>
    %275 = tpu.concatenate %272, %10 in 1 : vector<2x64xf32>, vector<2x64xf32> -> vector<2x128xf32>
    %276 = tpu.concatenate %10, %274 in 1 : vector<2x64xf32>, vector<2x64xf32> -> vector<2x128xf32>
    %277 = tpu.concatenate %275, %276 in 0 : vector<2x128xf32>, vector<2x128xf32> -> vector<4x128xf32>
    %cst_96 = arith.constant dense<0.000000e+00> : vector<4x128xf32>
    %278 = tpu.matmul %277, %0, %cst_96 {dimension_numbers = #tpu.dot_dimension_numbers<[1], [0], [0], [1], [0, 0, 1, 1], [], []>} : vector<4x128xf32>, vector<128x128xf32>, vector<4x128xf32> -> vector<4x128xf32>
    %279 = arith.addf %278, %9 : vector<4x128xf32>
    %280 = arith.negf %279 : vector<4x128xf32>
    %281 = math.exp %280 : vector<4x128xf32>
    %cst_97 = arith.constant 1.000000e+00 : f32
    %282 = vector.broadcast %cst_97 : f32 to vector<4x128xf32>
    %283 = arith.addf %282, %281 : vector<4x128xf32>
    %284 = arith.divf %282, %283 : vector<4x128xf32>
    %285 = vector.extract_strided_slice %279 {offsets = [0, 64], sizes = [4, 32], strides = [1, 1]} : vector<4x128xf32> to vector<4x32xf32>
    %286 = math.tanh %285 : vector<4x32xf32>
    %287 = vector.extract_strided_slice %284 {offsets = [0, 0], sizes = [4, 32], strides = [1, 1]} : vector<4x128xf32> to vector<4x32xf32>
    %288 = vector.extract_strided_slice %284 {offsets = [0, 32], sizes = [4, 32], strides = [1, 1]} : vector<4x128xf32> to vector<4x32xf32>
    %289 = vector.extract_strided_slice %284 {offsets = [0, 96], sizes = [4, 32], strides = [1, 1]} : vector<4x128xf32> to vector<4x32xf32>
    %290 = arith.mulf %288, %233 : vector<4x32xf32>
    %291 = arith.mulf %287, %286 : vector<4x32xf32>
    %292 = arith.addf %290, %291 : vector<4x32xf32>
    %293 = math.tanh %292 : vector<4x32xf32>
    %294 = arith.mulf %289, %293 : vector<4x32xf32>
    %295 = tpu.concatenate %259, %270 in 0 : vector<2x32xf32>, vector<2x32xf32> -> vector<4x32xf32>
    %296 = arith.addf %294, %295 : vector<4x32xf32>
    %297 = vector.extract_strided_slice %296 {offsets = [0, 0], sizes = [2, 32], strides = [1, 1]} : vector<4x32xf32> to vector<2x32xf32>
    %298 = arith.index_cast %c4_i32 : i32 to index
    %c0_98 = arith.constant 0 : index
    %c0_99 = arith.constant 0 : index
    %299 = vector.load %arg7[%298, %c0_98, %c0_99] : memref<8x2x64xf32, #tpu.memory_space<vmem>>, vector<1x2x32xf32>
    %300 = vector.shape_cast %299 : vector<1x2x32xf32> to vector<2x32xf32>
    %301 = vector.shape_cast %297 : vector<2x32xf32> to vector<1x2x32xf32>
    tpu.vector_store %arg7[%298, %c0_98, %c0_99], %301 {strides = array<i32>} : memref<8x2x64xf32, #tpu.memory_space<vmem>>, vector<1x2x32xf32>,
    %302 = vector.extract_strided_slice %296 {offsets = [2, 0], sizes = [2, 32], strides = [1, 1]} : vector<4x32xf32> to vector<2x32xf32>
    %303 = arith.index_cast %248 : i32 to index
    %c0_100 = arith.constant 0 : index
    %c32_101 = arith.constant 32 : index
    %304 = vector.load %arg7[%303, %c0_100, %c32_101] : memref<8x2x64xf32, #tpu.memory_space<vmem>>, vector<1x2x32xf32>
    %305 = vector.shape_cast %304 : vector<1x2x32xf32> to vector<2x32xf32>
    %306 = vector.shape_cast %302 : vector<2x32xf32> to vector<1x2x32xf32>
    tpu.vector_store %arg7[%303, %c0_100, %c32_101], %306 {strides = array<i32>} : memref<8x2x64xf32, #tpu.memory_space<vmem>>, vector<1x2x32xf32>,
    %c5_i32 = arith.constant 5 : i32
    %c7_i32_102 = arith.constant 7 : i32
    %307 = arith.subi %c7_i32_102, %c5_i32 : i32
    %308 = arith.index_cast %c5_i32 : i32 to index
    %c0_103 = arith.constant 0 : index
    %309 = memref.load %arg0[%308, %c0_103] : memref<8x2xi32, #tpu.memory_space<smem>>
    %310 = arith.index_cast %309 : i32 to index
    %c0_104 = arith.constant 0 : index
    %c0_105 = arith.constant 0 : index
    %311 = vector.load %arg1[%310, %c0_104, %c0_105] : memref<50x1x32xf32, #tpu.memory_space<vmem>>, vector<1x1x32xf32>
    %312 = vector.shape_cast %311 : vector<1x1x32xf32> to vector<1x32xf32>
    %313 = arith.index_cast %c5_i32 : i32 to index
    %c1_106 = arith.constant 1 : index
    %314 = memref.load %arg0[%313, %c1_106] : memref<8x2xi32, #tpu.memory_space<smem>>
    %315 = arith.index_cast %314 : i32 to index
    %c0_107 = arith.constant 0 : index
    %c0_108 = arith.constant 0 : index
    %316 = vector.load %arg1[%315, %c0_107, %c0_108] : memref<50x1x32xf32, #tpu.memory_space<vmem>>, vector<1x1x32xf32>
    %317 = vector.shape_cast %316 : vector<1x1x32xf32> to vector<1x32xf32>
    %318 = tpu.concatenate %312, %317 in 0 : vector<1x32xf32>, vector<1x32xf32> -> vector<2x32xf32>
    %319 = arith.index_cast %307 : i32 to index
    %c0_109 = arith.constant 0 : index
    %320 = memref.load %arg0[%319, %c0_109] : memref<8x2xi32, #tpu.memory_space<smem>>
    %321 = arith.index_cast %320 : i32 to index
    %c0_110 = arith.constant 0 : index
    %c0_111 = arith.constant 0 : index
    %322 = vector.load %arg1[%321, %c0_110, %c0_111] : memref<50x1x32xf32, #tpu.memory_space<vmem>>, vector<1x1x32xf32>
    %323 = vector.shape_cast %322 : vector<1x1x32xf32> to vector<1x32xf32>
    %324 = arith.index_cast %307 : i32 to index
    %c1_112 = arith.constant 1 : index
    %325 = memref.load %arg0[%324, %c1_112] : memref<8x2xi32, #tpu.memory_space<smem>>
    %326 = arith.index_cast %325 : i32 to index
    %c0_113 = arith.constant 0 : index
    %c0_114 = arith.constant 0 : index
    %327 = vector.load %arg1[%326, %c0_113, %c0_114] : memref<50x1x32xf32, #tpu.memory_space<vmem>>, vector<1x1x32xf32>
    %328 = vector.shape_cast %327 : vector<1x1x32xf32> to vector<1x32xf32>
    %329 = tpu.concatenate %323, %328 in 0 : vector<1x32xf32>, vector<1x32xf32> -> vector<2x32xf32>
    %330 = vector.extract_strided_slice %294 {offsets = [0, 0], sizes = [2, 32], strides = [1, 1]} : vector<4x32xf32> to vector<2x32xf32>
    %331 = tpu.concatenate %318, %330 in 1 : vector<2x32xf32>, vector<2x32xf32> -> vector<2x64xf32>
    %332 = vector.extract_strided_slice %294 {offsets = [2, 0], sizes = [2, 32], strides = [1, 1]} : vector<4x32xf32> to vector<2x32xf32>
    %333 = tpu.concatenate %329, %332 in 1 : vector<2x32xf32>, vector<2x32xf32> -> vector<2x64xf32>
    %334 = tpu.concatenate %331, %10 in 1 : vector<2x64xf32>, vector<2x64xf32> -> vector<2x128xf32>
    %335 = tpu.concatenate %10, %333 in 1 : vector<2x64xf32>, vector<2x64xf32> -> vector<2x128xf32>
    %336 = tpu.concatenate %334, %335 in 0 : vector<2x128xf32>, vector<2x128xf32> -> vector<4x128xf32>
    %cst_115 = arith.constant dense<0.000000e+00> : vector<4x128xf32>
    %337 = tpu.matmul %336, %0, %cst_115 {dimension_numbers = #tpu.dot_dimension_numbers<[1], [0], [0], [1], [0, 0, 1, 1], [], []>} : vector<4x128xf32>, vector<128x128xf32>, vector<4x128xf32> -> vector<4x128xf32>
    %338 = arith.addf %337, %9 : vector<4x128xf32>
    %339 = arith.negf %338 : vector<4x128xf32>
    %340 = math.exp %339 : vector<4x128xf32>
    %cst_116 = arith.constant 1.000000e+00 : f32
    %341 = vector.broadcast %cst_116 : f32 to vector<4x128xf32>
    %342 = arith.addf %341, %340 : vector<4x128xf32>
    %343 = arith.divf %341, %342 : vector<4x128xf32>
    %344 = vector.extract_strided_slice %338 {offsets = [0, 64], sizes = [4, 32], strides = [1, 1]} : vector<4x128xf32> to vector<4x32xf32>
    %345 = math.tanh %344 : vector<4x32xf32>
    %346 = vector.extract_strided_slice %343 {offsets = [0, 0], sizes = [4, 32], strides = [1, 1]} : vector<4x128xf32> to vector<4x32xf32>
    %347 = vector.extract_strided_slice %343 {offsets = [0, 32], sizes = [4, 32], strides = [1, 1]} : vector<4x128xf32> to vector<4x32xf32>
    %348 = vector.extract_strided_slice %343 {offsets = [0, 96], sizes = [4, 32], strides = [1, 1]} : vector<4x128xf32> to vector<4x32xf32>
    %349 = arith.mulf %347, %292 : vector<4x32xf32>
    %350 = arith.mulf %346, %345 : vector<4x32xf32>
    %351 = arith.addf %349, %350 : vector<4x32xf32>
    %352 = math.tanh %351 : vector<4x32xf32>
    %353 = arith.mulf %348, %352 : vector<4x32xf32>
    %354 = tpu.concatenate %318, %329 in 0 : vector<2x32xf32>, vector<2x32xf32> -> vector<4x32xf32>
    %355 = arith.addf %353, %354 : vector<4x32xf32>
    %356 = vector.extract_strided_slice %355 {offsets = [0, 0], sizes = [2, 32], strides = [1, 1]} : vector<4x32xf32> to vector<2x32xf32>
    %357 = arith.index_cast %c5_i32 : i32 to index
    %c0_117 = arith.constant 0 : index
    %c0_118 = arith.constant 0 : index
    %358 = vector.load %arg7[%357, %c0_117, %c0_118] : memref<8x2x64xf32, #tpu.memory_space<vmem>>, vector<1x2x32xf32>
    %359 = vector.shape_cast %358 : vector<1x2x32xf32> to vector<2x32xf32>
    %360 = vector.shape_cast %356 : vector<2x32xf32> to vector<1x2x32xf32>
    tpu.vector_store %arg7[%357, %c0_117, %c0_118], %360 {strides = array<i32>} : memref<8x2x64xf32, #tpu.memory_space<vmem>>, vector<1x2x32xf32>,
    %361 = vector.extract_strided_slice %355 {offsets = [2, 0], sizes = [2, 32], strides = [1, 1]} : vector<4x32xf32> to vector<2x32xf32>
    %362 = arith.index_cast %307 : i32 to index
    %c0_119 = arith.constant 0 : index
    %c32_120 = arith.constant 32 : index
    %363 = vector.load %arg7[%362, %c0_119, %c32_120] : memref<8x2x64xf32, #tpu.memory_space<vmem>>, vector<1x2x32xf32>
    %364 = vector.shape_cast %363 : vector<1x2x32xf32> to vector<2x32xf32>
    %365 = vector.shape_cast %361 : vector<2x32xf32> to vector<1x2x32xf32>
    tpu.vector_store %arg7[%362, %c0_119, %c32_120], %365 {strides = array<i32>} : memref<8x2x64xf32, #tpu.memory_space<vmem>>, vector<1x2x32xf32>,
    %c6_i32 = arith.constant 6 : i32
    %c7_i32_121 = arith.constant 7 : i32
    %366 = arith.subi %c7_i32_121, %c6_i32 : i32
    %367 = arith.index_cast %c6_i32 : i32 to index
    %c0_122 = arith.constant 0 : index
    %368 = memref.load %arg0[%367, %c0_122] : memref<8x2xi32, #tpu.memory_space<smem>>
    %369 = arith.index_cast %368 : i32 to index
    %c0_123 = arith.constant 0 : index
    %c0_124 = arith.constant 0 : index
    %370 = vector.load %arg1[%369, %c0_123, %c0_124] : memref<50x1x32xf32, #tpu.memory_space<vmem>>, vector<1x1x32xf32>
    %371 = vector.shape_cast %370 : vector<1x1x32xf32> to vector<1x32xf32>
    %372 = arith.index_cast %c6_i32 : i32 to index
    %c1_125 = arith.constant 1 : index
    %373 = memref.load %arg0[%372, %c1_125] : memref<8x2xi32, #tpu.memory_space<smem>>
    %374 = arith.index_cast %373 : i32 to index
    %c0_126 = arith.constant 0 : index
    %c0_127 = arith.constant 0 : index
    %375 = vector.load %arg1[%374, %c0_126, %c0_127] : memref<50x1x32xf32, #tpu.memory_space<vmem>>, vector<1x1x32xf32>
    %376 = vector.shape_cast %375 : vector<1x1x32xf32> to vector<1x32xf32>
    %377 = tpu.concatenate %371, %376 in 0 : vector<1x32xf32>, vector<1x32xf32> -> vector<2x32xf32>
    %378 = arith.index_cast %366 : i32 to index
    %c0_128 = arith.constant 0 : index
    %379 = memref.load %arg0[%378, %c0_128] : memref<8x2xi32, #tpu.memory_space<smem>>
    %380 = arith.index_cast %379 : i32 to index
    %c0_129 = arith.constant 0 : index
    %c0_130 = arith.constant 0 : index
    %381 = vector.load %arg1[%380, %c0_129, %c0_130] : memref<50x1x32xf32, #tpu.memory_space<vmem>>, vector<1x1x32xf32>
    %382 = vector.shape_cast %381 : vector<1x1x32xf32> to vector<1x32xf32>
    %383 = arith.index_cast %366 : i32 to index
    %c1_131 = arith.constant 1 : index
    %384 = memref.load %arg0[%383, %c1_131] : memref<8x2xi32, #tpu.memory_space<smem>>
    %385 = arith.index_cast %384 : i32 to index
    %c0_132 = arith.constant 0 : index
    %c0_133 = arith.constant 0 : index
    %386 = vector.load %arg1[%385, %c0_132, %c0_133] : memref<50x1x32xf32, #tpu.memory_space<vmem>>, vector<1x1x32xf32>
    %387 = vector.shape_cast %386 : vector<1x1x32xf32> to vector<1x32xf32>
    %388 = tpu.concatenate %382, %387 in 0 : vector<1x32xf32>, vector<1x32xf32> -> vector<2x32xf32>
    %389 = vector.extract_strided_slice %353 {offsets = [0, 0], sizes = [2, 32], strides = [1, 1]} : vector<4x32xf32> to vector<2x32xf32>
    %390 = tpu.concatenate %377, %389 in 1 : vector<2x32xf32>, vector<2x32xf32> -> vector<2x64xf32>
    %391 = vector.extract_strided_slice %353 {offsets = [2, 0], sizes = [2, 32], strides = [1, 1]} : vector<4x32xf32> to vector<2x32xf32>
    %392 = tpu.concatenate %388, %391 in 1 : vector<2x32xf32>, vector<2x32xf32> -> vector<2x64xf32>
    %393 = tpu.concatenate %390, %10 in 1 : vector<2x64xf32>, vector<2x64xf32> -> vector<2x128xf32>
    %394 = tpu.concatenate %10, %392 in 1 : vector<2x64xf32>, vector<2x64xf32> -> vector<2x128xf32>
    %395 = tpu.concatenate %393, %394 in 0 : vector<2x128xf32>, vector<2x128xf32> -> vector<4x128xf32>
    %cst_134 = arith.constant dense<0.000000e+00> : vector<4x128xf32>
    %396 = tpu.matmul %395, %0, %cst_134 {dimension_numbers = #tpu.dot_dimension_numbers<[1], [0], [0], [1], [0, 0, 1, 1], [], []>} : vector<4x128xf32>, vector<128x128xf32>, vector<4x128xf32> -> vector<4x128xf32>
    %397 = arith.addf %396, %9 : vector<4x128xf32>
    %398 = arith.negf %397 : vector<4x128xf32>
    %399 = math.exp %398 : vector<4x128xf32>
    %cst_135 = arith.constant 1.000000e+00 : f32
    %400 = vector.broadcast %cst_135 : f32 to vector<4x128xf32>
    %401 = arith.addf %400, %399 : vector<4x128xf32>
    %402 = arith.divf %400, %401 : vector<4x128xf32>
    %403 = vector.extract_strided_slice %397 {offsets = [0, 64], sizes = [4, 32], strides = [1, 1]} : vector<4x128xf32> to vector<4x32xf32>
    %404 = math.tanh %403 : vector<4x32xf32>
    %405 = vector.extract_strided_slice %402 {offsets = [0, 0], sizes = [4, 32], strides = [1, 1]} : vector<4x128xf32> to vector<4x32xf32>
    %406 = vector.extract_strided_slice %402 {offsets = [0, 32], sizes = [4, 32], strides = [1, 1]} : vector<4x128xf32> to vector<4x32xf32>
    %407 = vector.extract_strided_slice %402 {offsets = [0, 96], sizes = [4, 32], strides = [1, 1]} : vector<4x128xf32> to vector<4x32xf32>
    %408 = arith.mulf %406, %351 : vector<4x32xf32>
    %409 = arith.mulf %405, %404 : vector<4x32xf32>
    %410 = arith.addf %408, %409 : vector<4x32xf32>
    %411 = math.tanh %410 : vector<4x32xf32>
    %412 = arith.mulf %407, %411 : vector<4x32xf32>
    %413 = tpu.concatenate %377, %388 in 0 : vector<2x32xf32>, vector<2x32xf32> -> vector<4x32xf32>
    %414 = arith.addf %412, %413 : vector<4x32xf32>
    %415 = vector.extract_strided_slice %414 {offsets = [0, 0], sizes = [2, 32], strides = [1, 1]} : vector<4x32xf32> to vector<2x32xf32>
    %416 = arith.index_cast %c6_i32 : i32 to index
    %c0_136 = arith.constant 0 : index
    %c0_137 = arith.constant 0 : index
    %417 = vector.load %arg7[%416, %c0_136, %c0_137] : memref<8x2x64xf32, #tpu.memory_space<vmem>>, vector<1x2x32xf32>
    %418 = vector.shape_cast %417 : vector<1x2x32xf32> to vector<2x32xf32>
    %419 = vector.shape_cast %415 : vector<2x32xf32> to vector<1x2x32xf32>
    tpu.vector_store %arg7[%416, %c0_136, %c0_137], %419 {strides = array<i32>} : memref<8x2x64xf32, #tpu.memory_space<vmem>>, vector<1x2x32xf32>,
    %420 = vector.extract_strided_slice %414 {offsets = [2, 0], sizes = [2, 32], strides = [1, 1]} : vector<4x32xf32> to vector<2x32xf32>
    %421 = arith.index_cast %366 : i32 to index
    %c0_138 = arith.constant 0 : index
    %c32_139 = arith.constant 32 : index
    %422 = vector.load %arg7[%421, %c0_138, %c32_139] : memref<8x2x64xf32, #tpu.memory_space<vmem>>, vector<1x2x32xf32>
    %423 = vector.shape_cast %422 : vector<1x2x32xf32> to vector<2x32xf32>
    %424 = vector.shape_cast %420 : vector<2x32xf32> to vector<1x2x32xf32>
    tpu.vector_store %arg7[%421, %c0_138, %c32_139], %424 {strides = array<i32>} : memref<8x2x64xf32, #tpu.memory_space<vmem>>, vector<1x2x32xf32>,
    %c7_i32_140 = arith.constant 7 : i32
    %c7_i32_141 = arith.constant 7 : i32
    %425 = arith.subi %c7_i32_141, %c7_i32_140 : i32
    %426 = arith.index_cast %c7_i32_140 : i32 to index
    %c0_142 = arith.constant 0 : index
    %427 = memref.load %arg0[%426, %c0_142] : memref<8x2xi32, #tpu.memory_space<smem>>
    %428 = arith.index_cast %427 : i32 to index
    %c0_143 = arith.constant 0 : index
    %c0_144 = arith.constant 0 : index
    %429 = vector.load %arg1[%428, %c0_143, %c0_144] : memref<50x1x32xf32, #tpu.memory_space<vmem>>, vector<1x1x32xf32>
    %430 = vector.shape_cast %429 : vector<1x1x32xf32> to vector<1x32xf32>
    %431 = arith.index_cast %c7_i32_140 : i32 to index
    %c1_145 = arith.constant 1 : index
    %432 = memref.load %arg0[%431, %c1_145] : memref<8x2xi32, #tpu.memory_space<smem>>
    %433 = arith.index_cast %432 : i32 to index
    %c0_146 = arith.constant 0 : index
    %c0_147 = arith.constant 0 : index
    %434 = vector.load %arg1[%433, %c0_146, %c0_147] : memref<50x1x32xf32, #tpu.memory_space<vmem>>, vector<1x1x32xf32>
    %435 = vector.shape_cast %434 : vector<1x1x32xf32> to vector<1x32xf32>
    %436 = tpu.concatenate %430, %435 in 0 : vector<1x32xf32>, vector<1x32xf32> -> vector<2x32xf32>
    %437 = arith.index_cast %425 : i32 to index
    %c0_148 = arith.constant 0 : index
    %438 = memref.load %arg0[%437, %c0_148] : memref<8x2xi32, #tpu.memory_space<smem>>
    %439 = arith.index_cast %438 : i32 to index
    %c0_149 = arith.constant 0 : index
    %c0_150 = arith.constant 0 : index
    %440 = vector.load %arg1[%439, %c0_149, %c0_150] : memref<50x1x32xf32, #tpu.memory_space<vmem>>, vector<1x1x32xf32>
    %441 = vector.shape_cast %440 : vector<1x1x32xf32> to vector<1x32xf32>
    %442 = arith.index_cast %425 : i32 to index
    %c1_151 = arith.constant 1 : index
    %443 = memref.load %arg0[%442, %c1_151] : memref<8x2xi32, #tpu.memory_space<smem>>
    %444 = arith.index_cast %443 : i32 to index
    %c0_152 = arith.constant 0 : index
    %c0_153 = arith.constant 0 : index
    %445 = vector.load %arg1[%444, %c0_152, %c0_153] : memref<50x1x32xf32, #tpu.memory_space<vmem>>, vector<1x1x32xf32>
    %446 = vector.shape_cast %445 : vector<1x1x32xf32> to vector<1x32xf32>
    %447 = tpu.concatenate %441, %446 in 0 : vector<1x32xf32>, vector<1x32xf32> -> vector<2x32xf32>
    %448 = vector.extract_strided_slice %412 {offsets = [0, 0], sizes = [2, 32], strides = [1, 1]} : vector<4x32xf32> to vector<2x32xf32>
    %449 = tpu.concatenate %436, %448 in 1 : vector<2x32xf32>, vector<2x32xf32> -> vector<2x64xf32>
    %450 = vector.extract_strided_slice %412 {offsets = [2, 0], sizes = [2, 32], strides = [1, 1]} : vector<4x32xf32> to vector<2x32xf32>
    %451 = tpu.concatenate %447, %450 in 1 : vector<2x32xf32>, vector<2x32xf32> -> vector<2x64xf32>
    %452 = tpu.concatenate %449, %10 in 1 : vector<2x64xf32>, vector<2x64xf32> -> vector<2x128xf32>
    %453 = tpu.concatenate %10, %451 in 1 : vector<2x64xf32>, vector<2x64xf32> -> vector<2x128xf32>
    %454 = tpu.concatenate %452, %453 in 0 : vector<2x128xf32>, vector<2x128xf32> -> vector<4x128xf32>
    %cst_154 = arith.constant dense<0.000000e+00> : vector<4x128xf32>
    %455 = tpu.matmul %454, %0, %cst_154 {dimension_numbers = #tpu.dot_dimension_numbers<[1], [0], [0], [1], [0, 0, 1, 1], [], []>} : vector<4x128xf32>, vector<128x128xf32>, vector<4x128xf32> -> vector<4x128xf32>
    %456 = arith.addf %455, %9 : vector<4x128xf32>
    %457 = arith.negf %456 : vector<4x128xf32>
    %458 = math.exp %457 : vector<4x128xf32>
    %cst_155 = arith.constant 1.000000e+00 : f32
    %459 = vector.broadcast %cst_155 : f32 to vector<4x128xf32>
    %460 = arith.addf %459, %458 : vector<4x128xf32>
    %461 = arith.divf %459, %460 : vector<4x128xf32>
    %462 = vector.extract_strided_slice %456 {offsets = [0, 64], sizes = [4, 32], strides = [1, 1]} : vector<4x128xf32> to vector<4x32xf32>
    %463 = math.tanh %462 : vector<4x32xf32>
    %464 = vector.extract_strided_slice %461 {offsets = [0, 0], sizes = [4, 32], strides = [1, 1]} : vector<4x128xf32> to vector<4x32xf32>
    %465 = vector.extract_strided_slice %461 {offsets = [0, 32], sizes = [4, 32], strides = [1, 1]} : vector<4x128xf32> to vector<4x32xf32>
    %466 = vector.extract_strided_slice %461 {offsets = [0, 96], sizes = [4, 32], strides = [1, 1]} : vector<4x128xf32> to vector<4x32xf32>
    %467 = arith.mulf %465, %410 : vector<4x32xf32>
    %468 = arith.mulf %464, %463 : vector<4x32xf32>
    %469 = arith.addf %467, %468 : vector<4x32xf32>
    %470 = math.tanh %469 : vector<4x32xf32>
    %471 = arith.mulf %466, %470 : vector<4x32xf32>
    %472 = tpu.concatenate %436, %447 in 0 : vector<2x32xf32>, vector<2x32xf32> -> vector<4x32xf32>
    %473 = arith.addf %471, %472 : vector<4x32xf32>
    %474 = vector.extract_strided_slice %473 {offsets = [0, 0], sizes = [2, 32], strides = [1, 1]} : vector<4x32xf32> to vector<2x32xf32>
    %475 = arith.index_cast %c7_i32_140 : i32 to index
    %c0_156 = arith.constant 0 : index
    %c0_157 = arith.constant 0 : index
    %476 = vector.load %arg7[%475, %c0_156, %c0_157] : memref<8x2x64xf32, #tpu.memory_space<vmem>>, vector<1x2x32xf32>
    %477 = vector.shape_cast %476 : vector<1x2x32xf32> to vector<2x32xf32>
    %478 = vector.shape_cast %474 : vector<2x32xf32> to vector<1x2x32xf32>
    tpu.vector_store %arg7[%475, %c0_156, %c0_157], %478 {strides = array<i32>} : memref<8x2x64xf32, #tpu.memory_space<vmem>>, vector<1x2x32xf32>,
    %479 = vector.extract_strided_slice %473 {offsets = [2, 0], sizes = [2, 32], strides = [1, 1]} : vector<4x32xf32> to vector<2x32xf32>
    %480 = arith.index_cast %425 : i32 to index
    %c0_158 = arith.constant 0 : index
    %c32_159 = arith.constant 32 : index
    %481 = vector.load %arg7[%480, %c0_158, %c32_159] : memref<8x2x64xf32, #tpu.memory_space<vmem>>, vector<1x2x32xf32>
    %482 = vector.shape_cast %481 : vector<1x2x32xf32> to vector<2x32xf32>
    %483 = vector.shape_cast %479 : vector<2x32xf32> to vector<1x2x32xf32>
    tpu.vector_store %arg7[%480, %c0_158, %c32_159], %483 {strides = array<i32>} : memref<8x2x64xf32, #tpu.memory_space<vmem>>, vector<1x2x32xf32>,
    %c8_i32 = arith.constant 8 : i32
    %484 = vector.extract_strided_slice %469 {offsets = [0, 0], sizes = [2, 32], strides = [1, 1]} : vector<4x32xf32> to vector<2x32xf32>
    %485 = vector.extract_strided_slice %469 {offsets = [2, 0], sizes = [2, 32], strides = [1, 1]} : vector<4x32xf32> to vector<2x32xf32>
    %486 = tpu.concatenate %484, %485 in 1 : vector<2x32xf32>, vector<2x32xf32> -> vector<2x64xf32>
    %cst_160 = arith.constant dense<0.000000e+00> : vector<2x32xf32>
    %487 = tpu.matmul %486, %1, %cst_160 {dimension_numbers = #tpu.dot_dimension_numbers<[1], [0], [0], [1], [0, 0, 1, 1], [], []>} : vector<2x64xf32>, vector<64x32xf32>, vector<2x32xf32> -> vector<2x32xf32>
    %488 = vector.broadcast %2 : vector<1x32xf32> to vector<2x32xf32>
    %489 = arith.addf %487, %488 : vector<2x32xf32>
    %c0_161 = arith.constant 0 : index
    %c0_162 = arith.constant 0 : index
    %490 = vector.load %arg8[%c0_161, %c0_162] : memref<2x32xf32, #tpu.memory_space<vmem>>, vector<2x32xf32>
    tpu.vector_store %arg8[%c0_161, %c0_162], %489 {strides = array<i32>} : memref<2x32xf32, #tpu.memory_space<vmem>>, vector<2x32xf32>,
    %491 = math.tanh %489 : vector<2x32xf32>
    %c0_163 = arith.constant 0 : index
    %c0_164 = arith.constant 0 : index
    %492 = vector.load %arg9[%c0_163, %c0_164] : memref<2x32xf32, #tpu.memory_space<vmem>>, vector<2x32xf32>
    tpu.vector_store %arg9[%c0_163, %c0_164], %491 {strides = array<i32>} : memref<2x32xf32, #tpu.memory_space<vmem>>, vector<2x32xf32>,
    return
  }
}

</mosaic_0001>

<bundles_post_ra>
// kernel: encoder_forward.1
= control target key start
LH: loop header
LB: loop body
LE: loop exit
PB: predicated region body
PF: predicated region fallthrough
CT: control target
= control target key end

     0   :  { %15 = vsyncpa [#allocation4], 0  ;;  %s3158_s0 = inlined_call_operand.vmem [shape: s32[8,2], index: 0, kind: input, shape index: {}]   ;;  %s3159_s1 = inlined_call_operand.vmem [shape: f32[50,1,32], index: 1, kind: input, shape index: {}]   ;;  %s3160_s2 = inlined_call_operand.vmem [shape: f32[128,128], index: 2, kind: input, shape index: {}]   ;;  %s3161_s3 = inlined_call_operand.vmem [shape: f32[1,128], index: 3, kind: input, shape index: {}]   ;;  %s3162_s4 = inlined_call_operand.vmem [shape: f32[1,128], index: 4, kind: input, shape index: {}]   ;;  %s3163_s5 = inlined_call_operand.vmem [shape: f32[64,32], index: 5, kind: input, shape index: {}]   ;;  %s3164_s6 = inlined_call_operand.vmem [shape: f32[1,32], index: 6, kind: input, shape index: {}]   ;;  %s3165_s7 = inlined_call_operand.hbm [shape: f32[8,2,64], index: 7, kind: output, shape index: {0}]   ;;  %s3166_s8 = inlined_call_operand.hbm [shape: f32[2,32], index: 8, kind: output, shape index: {1}]   ;;  %s3167_s9 = inlined_call_operand.hbm [shape: f32[2,32], index: 9, kind: output, shape index: {2}]  }
   0x1   :  { %16 = vsyncpa [#allocation3], 0 }
   0x2   :  { %17 = vsyncpa [#allocation7], 0  ;;  %s24_s11 = sshll.u32 %s3158_s0, 4  ;;  %s25_s11 = int_to_ptr.vmem [resolvable:$true] %s24_s11 }
   0x3   :  { %s2336_s12 = scalar_lea.vmem %s25_s11, 128  ;;  %p2341_p1 = scmp.lt.s32.totalorder %s25_s11, %s25_s11 }
   0x4   :  { %p2337_p0 = scmp.ne.s32.totalorder %s25_s11, %s2336_s12  ;;  %p2342_p2 = scmp.lt.s32.totalorder %s2336_s12, %s2336_s12 }
   0x6   :  { %p2343_p3 = por %p2342_p2, %p2341_p1 }
   0x8   :  { %p2344_p4 = pnand %p2343_p3, %p2337_p0 }
   0xa   :  { %2347 = shalt.err (!%p2344_p4)
}
   0xb   :  { %s2420_s13 = smov [#allocation2]  }
   0xc   :  { %27 = dma.vmem_to_smem %s25_s11, 128, %s2420_s13, [#allocation4]  }
   0xd   :  { %2414 = dma.done.wait [#allocation4], 128  }
   0xe   :  { %2415 = vsyncadd [#allocation4], 4294967168 }
   0xf   :  { %43 = sfence }
  0x10   :  { %s1522_s14 = sld [smem:[#allocation2 + $0x380]]  ;;  %s1523_s15 = sld [smem:[#allocation2 + $0x381]]  ;;  %v44_v0 = vld [vmem:[%s3160_s2] sm:$0xff]  ;;  %v45_v1 = vld [vmem:[%s3160_s2 + $0x8] sm:$0xff]  ;;  %v46_v2 = vld [vmem:[%s3160_s2 + $0x10] sm:$0xff]  ;;  %v2421_v3 = vmov 0.0|0.0  }
  0x11   :  { %2020 = vmatprep.subr.bf16.mxu0 %v2421_v3  ;;  %v2494_v4 = vpack.c.bf16 %v45_v1, %v44_v0  ;;  %v47_v5 = vld [vmem:[%s3160_s2 + $0x18] sm:$0xff]  ;;  %2044 = vmatprep.subr.bf16.mxu1 %v2421_v3  ;;  %vm2422_vm0 = vmmov 0   ;;  %v2423_v6 = vmov 0.0   ;;  %vm97_vm1 = vcmask 1040384   ;;  %v48_v8 = vld [vmem:[%s3160_s2 + $0x20] sm:$0xff]  ;;  %v49_v9 = vld [vmem:[%s3160_s2 + $0x28] sm:$0xff] }
  0x12   :  { %1753 = vmatprep.mubr.msk.f32.mxu0 %vm2422_vm0, %v2423_v6  ;;  %1788 = vmatprep.mubr.msk.f32.mxu1 %vm2422_vm0, %v2423_v6  ;;  %v2505_v7 = vpack.c.bf16 %v47_v5, %v46_v2  ;;  %vm112_vm2 = vcmask 261120   ;;  %v2526_v13 = vpack.c.bf16 %v49_v9, %v48_v8  ;;  %v50_v15 = vld [vmem:[%s3160_s2 + $0x30] sm:$0xff]  ;;  %v51_v16 = vld [vmem:[%s3160_s2 + $0x38] sm:$0xff]  ;;  %s2424_s16 = smov 64   ;;  %v52_v18 = vld [vmem:[%s3160_s2 + $0x40] sm:$0xff]  ;;  %vm115_vm3 = vcmask 523264  }
  0x13   :  { %2022 = vmatpush3.bf16.msra.mxu0 %v2494_v4  ;;  %2046 = vmatpush3.bf16.msra.mxu1 %v2494_v4  ;;  %v2541_v17 = vpack.c.bf16 %v51_v16, %v50_v15  ;;  %v53_v19 = vld [vmem:[%s3160_s2 + $0x48] sm:$0xff]  ;;  %v54_v21 = vld [vmem:[%s3160_s2 + $0x50] sm:$0xff]  ;;  %v55_v22 = vld [vmem:[%s3160_s2 + $0x58] sm:$0xff]  ;;  %vm83_vm4 = vcmask 1041408   ;;  %s1530_s22 = sld [smem:[#allocation2 + $0x301]]  ;;  %s1536_s17 = sld [smem:[#allocation2 + $0x280]] }
  0x14   :  { %2023 = vmatprep.subr.bf16.mxu0 %v2421_v3  ;;  %2047 = vmatprep.subr.bf16.mxu1 %v2421_v3  ;;  %v2553_v20 = vpack.c.bf16 %v53_v19, %v52_v18  ;;  %v2565_v23 = vpack.c.bf16 %v55_v22, %v54_v21  ;;  %v56_v24 = vld [vmem:[%s3160_s2 + $0x60] sm:$0xff]  ;;  %v57_v25 = vld [vmem:[%s3160_s2 + $0x68] sm:$0xff]  ;;  %v58_v27 = vld [vmem:[%s3160_s2 + $0x70] sm:$0xff]  ;;  %s1527_s30 = sld [smem:[#allocation2 + $0x81]]  ;;  %s1533_s24 = sld [smem:[#allocation2 + $0x100]]  ;;  %vm233_vm5 = vcmask 254976  }
  0x15   :  { %v2577_v26 = vpack.c.bf16 %v57_v25, %v56_v24  ;;  %v59_v28 = vld [vmem:[%s3160_s2 + $0x78] sm:$0xff]  ;;  %s85_s2 = sld [smem:[#allocation2]]  ;;  %v1518_v39 = vld [vmem:[%s3161_s3] ss:$0 sm:$0xff]  ;;  %s2425_s3 = smov 32   ;;  %vm239_vm6 = vcmask 519426  }
  0x16   :  { %s100_s29 = scalar_lea.vmem %s3159_s1, %s1522_s14  ;;  %s103_s11 = scalar_lea.vmem %s3159_s1, %s1523_s15  ;;  %v2589_v29 = vpack.c.bf16 %v59_v28, %v58_v27  ;;  %v1519_v40 = vld [vmem:[%s3162_s4] ss:$0 sm:$0xff] }
  0x17   :  { %v101_v10 = vld [vmem:[%s100_s29] sm:$0x1]  ;;  %2025 = vmatpush3.bf16.msra.mxu0 %v2505_v7  ;;  %2049 = vmatpush3.bf16.msra.mxu1 %v2505_v7  ;;  %v2643_v41 = vsel %vm83_vm4, %v1518_v39, %v1519_v40  ;;  %s1529_s4 = sld [smem:[#allocation2 + $0x300]]  ;;  %s1537_s18 = sld [smem:[#allocation2 + $0x281]] }
  0x18   :  { %v1524_v11 = vld [vmem:[%s103_s11] ss:$0 sm:$0xff]  ;;  %2026 = vmatprep.subr.bf16.mxu0 %v2421_v3  ;;  %2050 = vmatprep.subr.bf16.mxu1 %v2421_v3  ;;  %s1520_s11 = sld [smem:[#allocation2 + $0x1]]  ;;  %s1526_s29 = sld [smem:[#allocation2 + $0x80]] }
  0x19   :  { %v2523_v12 = vsel %vm97_vm1, %v101_v10, %v1524_v11  ;;  %s2664_s28 = scalar_lea.vmem %s3159_s1, %s1530_s22  ;;  %s2728_s21 = scalar_lea.vmem %s3159_s1, %s1536_s17 }
  0x1a   :  { %v114_v14 = vsel %vm112_vm2, %v2523_v12, 0.0  ;;  %v1531_v60 = vld [vmem:[%s2664_s28] ss:$0 sm:$0xff]  ;;  %s2683_s15 = scalar_lea.vmem %s3159_s1, %s1527_s30  ;;  %s1534_s26 = sld [smem:[#allocation2 + $0x101]] }
  0x1b   :  { %118 = vrot.lane.b32.xlu0 %v114_v14, %s2424_s16  ;;  %2028 = vmatpush3.bf16.msra.mxu0 %v2526_v13  ;;  %s2601_s14 = scalar_lea.vmem %s3159_s1, %s85_s2  ;;  %v1528_v2 = vld [vmem:[%s2683_s15] ss:$0 sm:$0xff]  ;;  %s2747_s30 = scalar_lea.vmem %s3159_s1, %s1533_s24 }
  0x1c   :  { %2052 = vmatpush3.bf16.msra.mxu1 %v2526_v13  ;;  %2029 = vmatprep.subr.bf16.mxu0 %v2421_v3  ;;  %v87_v30 = vld [vmem:[%s2601_s14] sm:$0x1]  ;;  %s1543_s13 = sld [smem:[#allocation2 + $0x200]]  ;;  %s1544_s17 = sld [smem:[#allocation2 + $0x201]] }
  0x1d   :  { %2053 = vmatprep.subr.bf16.mxu1 %v2421_v3  ;;  %s2659_s25 = scalar_lea.vmem %s3159_s1, %s1529_s4  ;;  %s2733_s23 = scalar_lea.vmem %s3159_s1, %s1537_s18 }
  0x1e   :  { %s2606_s0 = scalar_lea.vmem %s3159_s1, %s1520_s11  ;;  %v256_v59 = vld [vmem:[%s2659_s25] sm:$0x1]  ;;  %s2678_s11 = scalar_lea.vmem %s3159_s1, %s1526_s29 }
  0x1f   :  { %2031 = vmatpush3.bf16.msra.mxu0 %v2541_v17  ;;  %v1521_v31 = vld [vmem:[%s2606_s0] ss:$0 sm:$0xff]  ;;  %v2669_v61 = vsel %vm97_vm1, %v256_v59, %v1531_v60  ;;  %s1541_s27 = sld [smem:[#allocation2 + $0x181]] }
  0x20   :  { %2055 = vmatpush3.bf16.msra.mxu1 %v2541_v17  ;;  %2032 = vmatprep.subr.bf16.mxu0 %v2421_v3  ;;  %v2611_v32 = vsel %vm97_vm1, %v87_v30, %v1521_v31  ;;  %v243_v1 = vld [vmem:[%s2678_s11] sm:$0x1]  ;;  %s2752_s12 = scalar_lea.vmem %s3159_s1, %s1534_s26  ;;  %s1540_s26 = sld [smem:[#allocation2 + $0x180]] }
  0x21   :  { %2056 = vmatprep.subr.bf16.mxu1 %v2421_v3  ;;  %v113_v33 = vsel %vm112_vm2, %v2611_v32, 0.0  ;;  %v2688_v8 = vsel %vm97_vm1, %v243_v1, %v1528_v2 }
  0x22   :  { %v116_v36 = vsel %vm115_vm3, %v113_v33, 0.0  ;;  %s2797_s20 = scalar_lea.vmem %s3159_s1, %s1543_s13  ;;  %s2802_s24 = scalar_lea.vmem %s3159_s1, %s1544_s17 }
  0x23   :  { %2034 = vmatpush3.bf16.msra.mxu0 %v2553_v20 }
  0x24   :  { %2058 = vmatpush3.bf16.msra.mxu1 %v2553_v20  ;;  %2035 = vmatprep.subr.bf16.mxu0 %v2421_v3 }
  0x25   :  { %2059 = vmatprep.subr.bf16.mxu1 %v2421_v3  ;;  %s2821_s18 = scalar_lea.vmem %s3159_s1, %s1541_s27 }
  0x26   :  { %s2816_s2 = scalar_lea.vmem %s3159_s1, %s1540_s26 }
  0x27   :  { %2037 = vmatpush3.bf16.msra.mxu0 %v2565_v23 }
  0x28   :  { %2061 = vmatpush3.bf16.msra.mxu1 %v2565_v23  ;;  %2038 = vmatprep.subr.bf16.mxu0 %v2421_v3 }
  0x29   :  { %2062 = vmatprep.subr.bf16.mxu1 %v2421_v3 }
  0x2b   :  { %2040 = vmatpush3.bf16.msra.mxu0 %v2577_v26 }
  0x2c   :  { %2064 = vmatpush3.bf16.msra.mxu1 %v2577_v26  ;;  %2041 = vmatprep.subr.bf16.mxu0 %v2421_v3 }
  0x2d   :  { %2065 = vmatprep.subr.bf16.mxu1 %v2421_v3 }
  0x2f   :  { %2043 = vmatpush3.bf16.msra.mxu0 %v2589_v29 }
  0x30   :  { %2067 = vmatpush3.bf16.msra.mxu1 %v2589_v29  ;;  %2068 = vmatprep.subr.bf16.mxu0 %v2421_v3 }
  0x31   :  { %2092 = vmatprep.subr.bf16.mxu1 %v2421_v3 }
  0x8d   :  { %v119_v34 = vpop.permute.xlu0 %118 }
  0x8e   :  { %v121_v35 = vsel %vm115_vm3, 0.0, %v119_v34 }
  0x8f   :  { %v123_v37 = vrot.slane %v121_v35, 6 }
  0x91   :  { %v125_v38 = vsel %vm83_vm4, %v116_v36, %v123_v37 }
  0x92   :  { %1754 = vmatmul.mubr.f32.vlgmr.msra.gmra.mrb[0].mxu0 %v125_v38 }
  0x93   :  { %2070 = vmatpush3.bf16.msra.mxu0 %v2494_v4  ;;  %1823 = vmatprep.mubr.msk.f32.mxu0 %vm2422_vm0, %v2423_v6 }
  0x94   :  { %2071 = vmatprep.subr.bf16.mxu0 %v2421_v3 }
  0x97   :  { %2073 = vmatpush3.bf16.msra.mxu0 %v2505_v7 }
  0x98   :  { %2074 = vmatprep.subr.bf16.mxu0 %v2421_v3 }
  0x9b   :  { %2076 = vmatpush3.bf16.msra.mxu0 %v2526_v13 }
  0x9c   :  { %2077 = vmatprep.subr.bf16.mxu0 %v2421_v3 }
  0x9f   :  { %2079 = vmatpush3.bf16.msra.mxu0 %v2541_v17 }
  0xa0   :  { %2080 = vmatprep.subr.bf16.mxu0 %v2421_v3 }
  0xa3   :  { %2082 = vmatpush3.bf16.msra.mxu0 %v2553_v20 }
  0xa4   :  { %2083 = vmatprep.subr.bf16.mxu0 %v2421_v3 }
  0xa7   :  { %2085 = vmatpush3.bf16.msra.mxu0 %v2565_v23 }
  0xa8   :  { %2086 = vmatprep.subr.bf16.mxu0 %v2421_v3 }
  0xab   :  { %2088 = vmatpush3.bf16.msra.mxu0 %v2577_v26 }
  0xac   :  { %2089 = vmatprep.subr.bf16.mxu0 %v2421_v3 }
  0xaf   :  { %2091 = vmatpush3.bf16.msra.mxu0 %v2589_v29 }
  0xb0   :  { %2116 = vmatprep.subr.bf16.mxu0 %v2421_v3 }
 0x165   :  { %v192_v42 = vpop.f32.mrb[0].mxu0 }
 0x166   :  { %v193_v43 = vadd.f32 %v192_v42, %v2643_v41  ;;  %v1755_v44 = vpop.f32.mrb[1].mxu0  ;;  %v416_v42 = vld [vmem:[%s2728_s21] sm:$0x1] }
 0x168   :  { %2270 = vtanh.f32 %v193_v43  ;;  %v1525_v46 = vmul.f32 -1.442695, %v193_v43  ;;  %v1538_v43 = vld [vmem:[%s2733_s23] ss:$0 sm:$0xff] }
 0x169   :  { %v2738_v44 = vsel %vm97_vm1, %v416_v42, %v1538_v43 }
 0x16a   :  { %2272 = vpow2.f32 %v1525_v46 }
 0x172   :  { %v2271_v45 = vpop.eup %2270 }
 0x173   :  { %205 = vrot.lane.b32.xlu0 %v2271_v45, %s2424_s16 }
 0x174   :  { %v2273_v47 = vpop.eup %2272 }
 0x175   :  { %v199_v48 = vadd.f32 1.0, %v2273_v47 }
 0x177   :  { %2274 = vrcp.f32 %v199_v48  ;;  %v403_v48 = vld [vmem:[%s2747_s30] sm:$0x1] }
 0x181   :  { %v2275_v49 = vpop.eup %2274 }
 0x182   :  { %v203_v52 = vmul.f32 0.0, %v2275_v49 }
 0x1e5   :  { %v206_v50 = vpop.permute.xlu0 %205 }
 0x1e6   :  { %v208_v51 = vmul.f32 %v2275_v49, %v206_v50 }
 0x1e8   :  { %210 = vrot.lane.b32.xlu1 %v208_v51, %s2425_s3 }
 0x25a   :  { %v211_v53 = vpop.permute.xlu1 %210 }
 0x25b   :  { %v2648_v54 = vadd.f32 %v211_v53, %v203_v52 }
 0x25d   :  { %2276 = vtanh.f32 %v2648_v54 }
 0x267   :  { %v2277_v55 = vpop.eup %2276 }
 0x268   :  { %216 = vrot.lane.b32.xlu1 %v2277_v55, %s2424_s16 }
 0x2da   :  { %v217_v56 = vpop.permute.xlu1 %216 }
 0x2db   :  { %v2652_v57 = vmul.f32 %v2275_v49, %v217_v56  ;;  %v1535_v49 = vld [vmem:[%s2752_s12] ss:$0 sm:$0xff] }
 0x2dc   :  { %v2757_v50 = vsel %vm97_vm1, %v403_v48, %v1535_v49 }
 0x2dd   :  { %v272_v58 = vrot.slane %v2652_v57, 2 }
 0x2df   :  { %273 = vrot.lane.b32.xlu0 %v272_v58, %s2424_s16 }
 0x351   :  { %v274_v62 = vpop.permute.xlu0 %273 }
 0x352   :  { %v276_v63 = vsel %vm112_vm2, %v2669_v61, %v274_v62 }
 0x353   :  { %v2235_v0 = vpack.i.bf16 %v2652_v57, %v276_v63 }
 0x355   :  { %2236 = vrot.lane.b32.xlu1 %v2235_v0, %s2424_s16 }
 0x3c7   :  { %v2237_v5 = vpop.permute.xlu1 %2236 }
 0x3c8   :  { %v2239_v9 = vunpack.i.h.bf16 %v2237_v5  ;;  %v2238_v10 = vunpack.i.l.bf16 %v2237_v5 }
 0x3ca   :  { %v282_v11 = vsel %vm115_vm3, 0.0, %v2238_v10  ;;  %v271_v14 = vsel %vm112_vm2, %v2688_v8, %v2239_v9 }
 0x3cb   :  { %v284_v15 = vrot.slane %v282_v11, 6  ;;  %v277_v16 = vsel %vm115_vm3, %v271_v14, 0.0 }
 0x3cd   :  { %v286_v18 = vsel %vm83_vm4, %v277_v16, %v284_v15 }
 0x3ce   :  { %1789 = vmatmul.mubr.f32.vlgmr.msra.gmra.mrb[0].mxu1 %v286_v18 }
 0x3cf   :  { %2094 = vmatpush3.bf16.msra.mxu1 %v2494_v4  ;;  %1858 = vmatprep.mubr.msk.f32.mxu1 %vm2422_vm0, %v2423_v6 }
 0x3d0   :  { %2095 = vmatprep.subr.bf16.mxu1 %v2421_v3 }
 0x3d3   :  { %2097 = vmatpush3.bf16.msra.mxu1 %v2505_v7 }
 0x3d4   :  { %2098 = vmatprep.subr.bf16.mxu1 %v2421_v3 }
 0x3d7   :  { %2100 = vmatpush3.bf16.msra.mxu1 %v2526_v13 }
 0x3d8   :  { %2101 = vmatprep.subr.bf16.mxu1 %v2421_v3 }
 0x3db   :  { %2103 = vmatpush3.bf16.msra.mxu1 %v2541_v17 }
 0x3dc   :  { %2104 = vmatprep.subr.bf16.mxu1 %v2421_v3 }
 0x3df   :  { %2106 = vmatpush3.bf16.msra.mxu1 %v2553_v20 }
 0x3e0   :  { %2107 = vmatprep.subr.bf16.mxu1 %v2421_v3 }
 0x3e3   :  { %2109 = vmatpush3.bf16.msra.mxu1 %v2565_v23 }
 0x3e4   :  { %2110 = vmatprep.subr.bf16.mxu1 %v2421_v3 }
 0x3e7   :  { %2112 = vmatpush3.bf16.msra.mxu1 %v2577_v26 }
 0x3e8   :  { %2113 = vmatprep.subr.bf16.mxu1 %v2421_v3 }
 0x3eb   :  { %2115 = vmatpush3.bf16.msra.mxu1 %v2589_v29 }
 0x3ec   :  { %2140 = vmatprep.subr.bf16.mxu1 %v2421_v3 }
 0x4a1   :  { %v353_v19 = vpop.f32.mrb[0].mxu1 }
 0x4a2   :  { %v354_v21 = vadd.f32 %v353_v19, %v2643_v41  ;;  %v1790_v22 = vpop.f32.mrb[1].mxu1 }
 0x4a4   :  { %2278 = vtanh.f32 %v354_v21  ;;  %v1532_v25 = vmul.f32 -1.442695, %v354_v21 }
 0x4a6   :  { %2280 = vpow2.f32 %v1532_v25  ;;  %v1545_v25 = vld [vmem:[%s2802_s24] ss:$0 sm:$0xff] }
 0x4ae   :  { %v2279_v24 = vpop.eup %2278 }
 0x4af   :  { %366 = vrot.lane.b32.xlu0 %v2279_v24, %s2424_s16  ;;  %v576_v24 = vld [vmem:[%s2797_s20] sm:$0x1] }
 0x4b0   :  { %v2281_v27 = vpop.eup %2280 }
 0x4b1   :  { %v360_v28 = vadd.f32 1.0, %v2281_v27  ;;  %v2807_v27 = vsel %vm97_vm1, %v576_v24, %v1545_v25 }
 0x4b3   :  { %2282 = vrcp.f32 %v360_v28 }
 0x4bd   :  { %v2283_v30 = vpop.eup %2282 }
 0x4be   :  { %v364_v34 = vmul.f32 %v2283_v30, %v2648_v54 }
 0x521   :  { %v367_v31 = vpop.permute.xlu0 %366 }
 0x522   :  { %v369_v33 = vmul.f32 %v2283_v30, %v367_v31 }
 0x524   :  { %371 = vrot.lane.b32.xlu1 %v369_v33, %s2425_s3  ;;  %v563_v33 = vld [vmem:[%s2816_s2] sm:$0x1] }
 0x596   :  { %v372_v35 = vpop.permute.xlu1 %371 }
 0x597   :  { %v2717_v36 = vadd.f32 %v372_v35, %v364_v34  ;;  %v1542_v34 = vld [vmem:[%s2821_s18] ss:$0 sm:$0xff] }
 0x598   :  { %v2826_v35 = vsel %vm97_vm1, %v563_v33, %v1542_v34 }
 0x599   :  { %2284 = vtanh.f32 %v2717_v36 }
 0x5a3   :  { %v2285_v37 = vpop.eup %2284 }
 0x5a4   :  { %377 = vrot.lane.b32.xlu0 %v2285_v37, %s2424_s16 }
 0x616   :  { %v378_v38 = vpop.permute.xlu0 %377 }
 0x617   :  { %v2721_v39 = vmul.f32 %v2283_v30, %v378_v38 }
 0x619   :  { %v432_v40 = vrot.slane %v2721_v39, 2 }
 0x61b   :  { %433 = vrot.lane.b32.xlu1 %v432_v40, %s2424_s16 }
 0x68d   :  { %v434_v45 = vpop.permute.xlu1 %433 }
 0x68e   :  { %v436_v46 = vsel %vm112_vm2, %v2738_v44, %v434_v45 }
 0x68f   :  { %v2240_v47 = vpack.i.bf16 %v2721_v39, %v436_v46 }
 0x691   :  { %2241 = vrot.lane.b32.xlu0 %v2240_v47, %s2424_s16 }
 0x703   :  { %v2242_v51 = vpop.permute.xlu0 %2241 }
 0x704   :  { %v2244_v52 = vunpack.i.h.bf16 %v2242_v51  ;;  %v2243_v53 = vunpack.i.l.bf16 %v2242_v51 }
 0x706   :  { %v431_v54 = vsel %vm112_vm2, %v2757_v50, %v2244_v52  ;;  %v442_v55 = vsel %vm115_vm3, 0.0, %v2243_v53 }
 0x707   :  { %v444_v56 = vrot.slane %v442_v55, 6  ;;  %v437_v58 = vsel %vm115_vm3, %v431_v54, 0.0 }
 0x709   :  { %v446_v59 = vsel %vm83_vm4, %v437_v58, %v444_v56 }
 0x70a   :  { %1824 = vmatmul.mubr.f32.vlgmr.msra.gmra.mrb[2].mxu0 %v446_v59 }
 0x70b   :  { %2118 = vmatpush3.bf16.msra.mxu0 %v2494_v4  ;;  %1893 = vmatprep.mubr.msk.f32.mxu0 %vm2422_vm0, %v2423_v6 }
 0x70c   :  { %2119 = vmatprep.subr.bf16.mxu0 %v2421_v3 }
 0x70f   :  { %2121 = vmatpush3.bf16.msra.mxu0 %v2505_v7 }
 0x710   :  { %2122 = vmatprep.subr.bf16.mxu0 %v2421_v3 }
 0x713   :  { %2124 = vmatpush3.bf16.msra.mxu0 %v2526_v13 }
 0x714   :  { %2125 = vmatprep.subr.bf16.mxu0 %v2421_v3 }
 0x717   :  { %2127 = vmatpush3.bf16.msra.mxu0 %v2541_v17 }
 0x718   :  { %2128 = vmatprep.subr.bf16.mxu0 %v2421_v3 }
 0x71b   :  { %2130 = vmatpush3.bf16.msra.mxu0 %v2553_v20 }
 0x71c   :  { %2131 = vmatprep.subr.bf16.mxu0 %v2421_v3 }
 0x71f   :  { %2133 = vmatpush3.bf16.msra.mxu0 %v2565_v23 }
 0x720   :  { %2134 = vmatprep.subr.bf16.mxu0 %v2421_v3 }
 0x723   :  { %2136 = vmatpush3.bf16.msra.mxu0 %v2577_v26 }
 0x724   :  { %2137 = vmatprep.subr.bf16.mxu0 %v2421_v3 }
 0x727   :  { %2139 = vmatpush3.bf16.msra.mxu0 %v2589_v29 }
 0x728   :  { %2164 = vmatprep.subr.bf16.mxu0 %v2421_v3 }
 0x7dd   :  { %v513_v60 = vpop.f32.mrb[2].mxu0 }
 0x7de   :  { %v514_v62 = vadd.f32 %v513_v60, %v2643_v41  ;;  %v1825_v63 = vpop.f32.mrb[3].mxu0 }
 0x7e0   :  { %2286 = vtanh.f32 %v514_v62  ;;  %v1539_v1 = vmul.f32 -1.442695, %v514_v62 }
 0x7e2   :  { %2288 = vpow2.f32 %v1539_v1 }
 0x7ea   :  { %v2287_v0 = vpop.eup %2286 }
 0x7eb   :  { %526 = vrot.lane.b32.xlu1 %v2287_v0, %s2424_s16 }
 0x7ec   :  { %v2289_v2 = vpop.eup %2288 }
 0x7ed   :  { %v520_v5 = vadd.f32 1.0, %v2289_v2 }
 0x7ef   :  { %2290 = vrcp.f32 %v520_v5  ;;  %v736_v5 = vld [vmem:[%s2816_s2] sm:$0x1] }
 0x7f9   :  { %v2291_v9 = vpop.eup %2290 }
 0x7fa   :  { %v524_v14 = vmul.f32 %v2291_v9, %v2717_v36 }
 0x85d   :  { %v527_v10 = vpop.permute.xlu1 %526 }
 0x85e   :  { %v529_v11 = vmul.f32 %v2291_v9, %v527_v10 }
 0x860   :  { %531 = vrot.lane.b32.xlu0 %v529_v11, %s2425_s3 }
 0x8d2   :  { %v532_v15 = vpop.permute.xlu0 %531 }
 0x8d3   :  { %v2786_v16 = vadd.f32 %v532_v15, %v524_v14 }
 0x8d5   :  { %2292 = vtanh.f32 %v2786_v16 }
 0x8df   :  { %v2293_v18 = vpop.eup %2292 }
 0x8e0   :  { %537 = vrot.lane.b32.xlu1 %v2293_v18, %s2424_s16  ;;  %v1549_v18 = vld [vmem:[%s2802_s24] ss:$0 sm:$0xff] }
 0x952   :  { %v538_v19 = vpop.permute.xlu1 %537 }
 0x953   :  { %v2790_v21 = vmul.f32 %v2291_v9, %v538_v19  ;;  %v1552_v9 = vld [vmem:[%s2821_s18] ss:$0 sm:$0xff] }
 0x954   :  { %v2863_v10 = vsel %vm97_vm1, %v736_v5, %v1552_v9  ;;  %v1556_v5 = vld [vmem:[%s2733_s23] ss:$0 sm:$0xff] }
 0x955   :  { %v592_v22 = vrot.slane %v2790_v21, 2 }
 0x957   :  { %593 = vrot.lane.b32.xlu0 %v592_v22, %s2424_s16 }
 0x9c9   :  { %v594_v28 = vpop.permute.xlu0 %593 }
 0x9ca   :  { %v596_v30 = vsel %vm112_vm2, %v2807_v27, %v594_v28 }
 0x9cb   :  { %v2245_v31 = vpack.i.bf16 %v2790_v21, %v596_v30 }
 0x9cd   :  { %2246 = vrot.lane.b32.xlu1 %v2245_v31, %s2424_s16 }
 0xa3f   :  { %v2247_v36 = vpop.permute.xlu1 %2246 }
 0xa40   :  { %v2249_v37 = vunpack.i.h.bf16 %v2247_v36  ;;  %v2248_v38 = vunpack.i.l.bf16 %v2247_v36 }
 0xa42   :  { %v591_v40 = vsel %vm112_vm2, %v2826_v35, %v2249_v37  ;;  %v602_v42 = vsel %vm115_vm3, 0.0, %v2248_v38 }
 0xa43   :  { %v604_v43 = vrot.slane %v602_v42, 6  ;;  %v597_v45 = vsel %vm115_vm3, %v591_v40, 0.0 }
 0xa45   :  { %v606_v46 = vsel %vm83_vm4, %v597_v45, %v604_v43 }
 0xa46   :  { %1859 = vmatmul.mubr.f32.vlgmr.msra.gmra.mrb[2].mxu1 %v606_v46 }
 0xa47   :  { %2142 = vmatpush3.bf16.msra.mxu1 %v2494_v4  ;;  %1928 = vmatprep.mubr.msk.f32.mxu1 %vm2422_vm0, %v2423_v6 }
 0xa48   :  { %2143 = vmatprep.subr.bf16.mxu1 %v2421_v3 }
 0xa4b   :  { %2145 = vmatpush3.bf16.msra.mxu1 %v2505_v7 }
 0xa4c   :  { %2146 = vmatprep.subr.bf16.mxu1 %v2421_v3 }
 0xa4f   :  { %2148 = vmatpush3.bf16.msra.mxu1 %v2526_v13 }
 0xa50   :  { %2149 = vmatprep.subr.bf16.mxu1 %v2421_v3 }
 0xa53   :  { %2151 = vmatpush3.bf16.msra.mxu1 %v2541_v17 }
 0xa54   :  { %2152 = vmatprep.subr.bf16.mxu1 %v2421_v3 }
 0xa57   :  { %2154 = vmatpush3.bf16.msra.mxu1 %v2553_v20 }
 0xa58   :  { %2155 = vmatprep.subr.bf16.mxu1 %v2421_v3 }
 0xa5b   :  { %2157 = vmatpush3.bf16.msra.mxu1 %v2565_v23 }
 0xa5c   :  { %2158 = vmatprep.subr.bf16.mxu1 %v2421_v3 }
 0xa5f   :  { %2160 = vmatpush3.bf16.msra.mxu1 %v2577_v26 }
 0xa60   :  { %2161 = vmatprep.subr.bf16.mxu1 %v2421_v3 }
 0xa63   :  { %2163 = vmatpush3.bf16.msra.mxu1 %v2589_v29 }
 0xa64   :  { %2188 = vmatprep.subr.bf16.mxu1 %v2421_v3 }
 0xb19   :  { %v673_v47 = vpop.f32.mrb[2].mxu1 }
 0xb1a   :  { %v674_v48 = vadd.f32 %v673_v47, %v2643_v41  ;;  %v1860_v49 = vpop.f32.mrb[3].mxu1 }
 0xb1c   :  { %2294 = vtanh.f32 %v674_v48  ;;  %v1546_v52 = vmul.f32 -1.442695, %v674_v48 }
 0xb1e   :  { %2296 = vpow2.f32 %v1546_v52 }
 0xb26   :  { %v2295_v51 = vpop.eup %2294 }
 0xb27   :  { %686 = vrot.lane.b32.xlu0 %v2295_v51, %s2424_s16 }
 0xb28   :  { %v2297_v53 = vpop.eup %2296 }
 0xb29   :  { %v680_v54 = vadd.f32 1.0, %v2297_v53 }
 0xb2b   :  { %2298 = vrcp.f32 %v680_v54 }
 0xb35   :  { %v2299_v55 = vpop.eup %2298 }
 0xb36   :  { %v684_v59 = vmul.f32 %v2299_v55, %v2786_v16  ;;  %v723_v16 = vld [vmem:[%s2797_s20] sm:$0x1] }
 0xb37   :  { %v2872_v19 = vsel %vm97_vm1, %v723_v16, %v1549_v18 }
 0xb99   :  { %v687_v56 = vpop.permute.xlu0 %686 }
 0xb9a   :  { %v689_v58 = vmul.f32 %v2299_v55, %v687_v56 }
 0xb9c   :  { %691 = vrot.lane.b32.xlu1 %v689_v58, %s2425_s3  ;;  %v894_v58 = vld [vmem:[%s2747_s30] sm:$0x1] }
 0xc0e   :  { %v692_v60 = vpop.permute.xlu1 %691 }
 0xc0f   :  { %v694_v62 = vadd.f32 %v692_v60, %v684_v59  ;;  %v1559_v59 = vld [vmem:[%s2752_s12] ss:$0 sm:$0xff] }
 0xc10   :  { %v2908_v60 = vsel %vm97_vm1, %v894_v58, %v1559_v59 }
 0xc11   :  { %2300 = vtanh.f32 %v694_v62 }
 0xc1b   :  { %v2301_v63 = vpop.eup %2300 }
 0xc1c   :  { %697 = vrot.lane.b32.xlu0 %v2301_v63, %s2424_s16 }
 0xc8e   :  { %v698_v0 = vpop.permute.xlu0 %697 }
 0xc8f   :  { %v2856_v1 = vmul.f32 %v2299_v55, %v698_v0 }
 0xc91   :  { %v752_v2 = vrot.slane %v2856_v1, 2 }
 0xc93   :  { %753 = vrot.lane.b32.xlu1 %v752_v2, %s2424_s16  ;;  %v881_v2 = vld [vmem:[%s2728_s21] sm:$0x1] }
 0xc94   :  { %v2917_v9 = vsel %vm97_vm1, %v881_v2, %v1556_v5 }
 0xd05   :  { %v754_v11 = vpop.permute.xlu1 %753 }
 0xd06   :  { %v756_v14 = vsel %vm112_vm2, %v2863_v10, %v754_v11 }
 0xd07   :  { %v2250_v15 = vpack.i.bf16 %v2856_v1, %v756_v14 }
 0xd09   :  { %2251 = vrot.lane.b32.xlu0 %v2250_v15, %s2424_s16 }
 0xd7b   :  { %v2252_v22 = vpop.permute.xlu0 %2251 }
 0xd7c   :  { %v2254_v24 = vunpack.i.h.bf16 %v2252_v22  ;;  %v2253_v25 = vunpack.i.l.bf16 %v2252_v22 }
 0xd7e   :  { %v751_v28 = vsel %vm112_vm2, %v2872_v19, %v2254_v24  ;;  %v762_v30 = vsel %vm115_vm3, 0.0, %v2253_v25 }
 0xd7f   :  { %v764_v31 = vrot.slane %v762_v30, 6  ;;  %v757_v33 = vsel %vm115_vm3, %v751_v28, 0.0 }
 0xd81   :  { %v766_v34 = vsel %vm83_vm4, %v757_v33, %v764_v31 }
 0xd82   :  { %1894 = vmatmul.mubr.f32.vlgmr.msra.gmra.mrb[4].mxu0 %v766_v34 }
 0xd83   :  { %2166 = vmatpush3.bf16.msra.mxu0 %v2494_v4  ;;  %1963 = vmatprep.mubr.msk.f32.mxu0 %vm2422_vm0, %v2423_v6 }
 0xd84   :  { %2167 = vmatprep.subr.bf16.mxu0 %v2421_v3 }
 0xd87   :  { %2169 = vmatpush3.bf16.msra.mxu0 %v2505_v7 }
 0xd88   :  { %2170 = vmatprep.subr.bf16.mxu0 %v2421_v3 }
 0xd8b   :  { %2172 = vmatpush3.bf16.msra.mxu0 %v2526_v13 }
 0xd8c   :  { %2173 = vmatprep.subr.bf16.mxu0 %v2421_v3 }
 0xd8f   :  { %2175 = vmatpush3.bf16.msra.mxu0 %v2541_v17 }
 0xd90   :  { %2176 = vmatprep.subr.bf16.mxu0 %v2421_v3 }
 0xd93   :  { %2178 = vmatpush3.bf16.msra.mxu0 %v2553_v20 }
 0xd94   :  { %2179 = vmatprep.subr.bf16.mxu0 %v2421_v3 }
 0xd97   :  { %2181 = vmatpush3.bf16.msra.mxu0 %v2565_v23 }
 0xd98   :  { %2182 = vmatprep.subr.bf16.mxu0 %v2421_v3 }
 0xd9b   :  { %2184 = vmatpush3.bf16.msra.mxu0 %v2577_v26 }
 0xd9c   :  { %2185 = vmatprep.subr.bf16.mxu0 %v2421_v3 }
 0xd9f   :  { %2187 = vmatpush3.bf16.msra.mxu0 %v2589_v29 }
 0xda0   :  { %2212 = vmatprep.subr.bf16.mxu0 %v2421_v3 }
 0xe55   :  { %v833_v36 = vpop.f32.mrb[4].mxu0 }
 0xe56   :  { %v834_v37 = vadd.f32 %v833_v36, %v2643_v41  ;;  %v1895_v38 = vpop.f32.mrb[5].mxu0 }
 0xe58   :  { %2302 = vtanh.f32 %v834_v37  ;;  %v1553_v42 = vmul.f32 -1.442695, %v834_v37 }
 0xe5a   :  { %2304 = vpow2.f32 %v1553_v42  ;;  %v1052_v42 = vld [vmem:[%s2678_s11] sm:$0x1] }
 0xe62   :  { %v2303_v40 = vpop.eup %2302 }
 0xe63   :  { %846 = vrot.lane.b32.xlu1 %v2303_v40, %s2424_s16 }
 0xe64   :  { %v2305_v43 = vpop.eup %2304 }
 0xe65   :  { %v840_v45 = vadd.f32 1.0, %v2305_v43  ;;  %v1566_v43 = vld [vmem:[%s2683_s15] ss:$0 sm:$0xff] }
 0xe67   :  { %2306 = vrcp.f32 %v840_v45  ;;  %v2952_v45 = vsel %vm97_vm1, %v1052_v42, %v1566_v43 }
 0xe71   :  { %v2307_v46 = vpop.eup %2306 }
 0xe72   :  { %v844_v49 = vmul.f32 %v2307_v46, %v694_v62 }
 0xed5   :  { %v847_v47 = vpop.permute.xlu1 %846 }
 0xed6   :  { %v849_v48 = vmul.f32 %v2307_v46, %v847_v47 }
 0xed8   :  { %851 = vrot.lane.b32.xlu0 %v849_v48, %s2425_s3 }
 0xf4a   :  { %v852_v51 = vpop.permute.xlu0 %851 }
 0xf4b   :  { %v854_v52 = vadd.f32 %v852_v51, %v844_v49  ;;  %v1039_v49 = vld [vmem:[%s2659_s25] sm:$0x1]  ;;  %s1568_s25 = sld [smem:[#allocation2 + $0x380]] }
 0xf4c   :  { %v1563_v51 = vld [vmem:[%s2664_s28] ss:$0 sm:$0xff]  ;;  %s1569_s28 = sld [smem:[#allocation2 + $0x381]] }
 0xf4d   :  { %2308 = vtanh.f32 %v854_v52 }
 0xf51   :  { %s1196_s21 = scalar_lea.vmem %s3159_s1, %s1568_s25 }
 0xf57   :  { %v2309_v53 = vpop.eup %2308 }
 0xf58   :  { %857 = vrot.lane.b32.xlu1 %v2309_v53, %s2424_s16 }
 0xfca   :  { %v858_v54 = vpop.permute.xlu1 %857 }
 0xfcb   :  { %v2901_v55 = vmul.f32 %v2307_v46, %v858_v54 }
 0xfcd   :  { %v910_v56 = vrot.slane %v2901_v55, 2 }
 0xfcf   :  { %911 = vrot.lane.b32.xlu0 %v910_v56, %s2424_s16 }
0x1041   :  { %v912_v62 = vpop.permute.xlu0 %911 }
0x1042   :  { %v914_v63 = vsel %vm112_vm2, %v2908_v60, %v912_v62 }
0x1043   :  { %v2255_v0 = vpack.i.bf16 %v2901_v55, %v914_v63 }
0x1045   :  { %2256 = vrot.lane.b32.xlu1 %v2255_v0, %s2424_s16 }
0x10b7   :  { %v2257_v11 = vpop.permute.xlu1 %2256 }
0x10b8   :  { %v2259_v14 = vunpack.i.h.bf16 %v2257_v11  ;;  %v2258_v15 = vunpack.i.l.bf16 %v2257_v11 }
0x10ba   :  { %v909_v16 = vsel %vm112_vm2, %v2917_v9, %v2259_v14  ;;  %v920_v18 = vsel %vm115_vm3, 0.0, %v2258_v15 }
0x10bb   :  { %v922_v22 = vrot.slane %v920_v18, 6  ;;  %v915_v24 = vsel %vm115_vm3, %v909_v16, 0.0 }
0x10bd   :  { %v924_v25 = vsel %vm83_vm4, %v915_v24, %v922_v22 }
0x10be   :  { %1929 = vmatmul.mubr.f32.vlgmr.msra.gmra.mrb[4].mxu1 %v924_v25 }
0x10bf   :  { %2190 = vmatpush3.bf16.msra.mxu1 %v2494_v4  ;;  %1998 = vmatprep.mubr.msk.f32.mxu1 %vm2422_vm0, %v2423_v6 }
0x10c0   :  { %2191 = vmatprep.subr.bf16.mxu1 %v2421_v3 }
0x10c3   :  { %2193 = vmatpush3.bf16.msra.mxu1 %v2505_v7 }
0x10c4   :  { %2194 = vmatprep.subr.bf16.mxu1 %v2421_v3 }
0x10c7   :  { %2196 = vmatpush3.bf16.msra.mxu1 %v2526_v13 }
0x10c8   :  { %2197 = vmatprep.subr.bf16.mxu1 %v2421_v3 }
0x10cb   :  { %2199 = vmatpush3.bf16.msra.mxu1 %v2541_v17 }
0x10cc   :  { %2200 = vmatprep.subr.bf16.mxu1 %v2421_v3 }
0x10cf   :  { %2202 = vmatpush3.bf16.msra.mxu1 %v2553_v20 }
0x10d0   :  { %2203 = vmatprep.subr.bf16.mxu1 %v2421_v3 }
0x10d3   :  { %2205 = vmatpush3.bf16.msra.mxu1 %v2565_v23 }
0x10d4   :  { %2206 = vmatprep.subr.bf16.mxu1 %v2421_v3 }
0x10d7   :  { %2208 = vmatpush3.bf16.msra.mxu1 %v2577_v26 }
0x10d8   :  { %2209 = vmatprep.subr.bf16.mxu1 %v2421_v3 }
0x10db   :  { %2211 = vmatpush3.bf16.msra.mxu1 %v2589_v29 }
0x1191   :  { %v991_v4 = vpop.f32.mrb[4].mxu1 }
0x1192   :  { %v992_v7 = vadd.f32 %v991_v4, %v2643_v41  ;;  %v1930_v13 = vpop.f32.mrb[5].mxu1 }
0x1194   :  { %2310 = vtanh.f32 %v992_v7  ;;  %v1560_v20 = vmul.f32 -1.442695, %v992_v7 }
0x1196   :  { %2312 = vpow2.f32 %v1560_v20 }
0x119e   :  { %v2311_v17 = vpop.eup %2310 }
0x119f   :  { %1004 = vrot.lane.b32.xlu0 %v2311_v17, %s2424_s16 }
0x11a0   :  { %v2313_v28 = vpop.eup %2312 }
0x11a1   :  { %v998_v23 = vadd.f32 1.0, %v2313_v28 }
0x11a3   :  { %2314 = vrcp.f32 %v998_v23  ;;  %v1210_v23 = vld [vmem:[%s2601_s14] sm:$0x1] }
0x11ad   :  { %v2315_v26 = vpop.eup %2314 }
0x11ae   :  { %v1002_v29 = vmul.f32 %v2315_v26, %v854_v52  ;;  %v2961_v52 = vsel %vm97_vm1, %v1039_v49, %v1563_v51 }
0x1211   :  { %v1005_v30 = vpop.permute.xlu0 %1004 }
0x1212   :  { %v1007_v31 = vmul.f32 %v2315_v26, %v1005_v30 }
0x1214   :  { %1009 = vrot.lane.b32.xlu1 %v1007_v31, %s2425_s3 }
0x1286   :  { %v1010_v33 = vpop.permute.xlu1 %1009 }
0x1287   :  { %v1012_v34 = vadd.f32 %v1010_v33, %v1002_v29 }
0x1289   :  { %2316 = vtanh.f32 %v1012_v34 }
0x1293   :  { %v2317_v36 = vpop.eup %2316 }
0x1294   :  { %1015 = vrot.lane.b32.xlu0 %v2317_v36, %s2424_s16 }
0x1306   :  { %v1016_v37 = vpop.permute.xlu0 %1015 }
0x1307   :  { %v2945_v38 = vmul.f32 %v2315_v26, %v1016_v37  ;;  %v1572_v26 = vld [vmem:[%s2606_s0] ss:$0 sm:$0xff]  ;;  %s1199_s0 = scalar_lea.vmem %s3159_s1, %s1569_s28  ;;  %s2426_s1 = smov 96  }
0x1308   :  { %v2984_v30 = vsel %vm97_vm1, %v1210_v23, %v1572_v26  ;;  %v1570_v36 = vld [vmem:[%s1199_s0] ss:$0 sm:$0xff] }
0x1309   :  { %v1068_v40 = vrot.slane %v2945_v38, 2 }
0x130b   :  { %1069 = vrot.lane.b32.xlu1 %v1068_v40, %s2424_s16 }
0x137d   :  { %v1070_v46 = vpop.permute.xlu1 %1069 }
0x137e   :  { %v1072_v47 = vsel %vm112_vm2, %v2952_v45, %v1070_v46 }
0x137f   :  { %v2260_v48 = vpack.i.bf16 %v2945_v38, %v1072_v47 }
0x1381   :  { %2261 = vrot.lane.b32.xlu0 %v2260_v48, %s2424_s16 }
0x13f3   :  { %v2262_v53 = vpop.permute.xlu0 %2261 }
0x13f4   :  { %v2264_v54 = vunpack.i.h.bf16 %v2262_v53  ;;  %v2263_v56 = vunpack.i.l.bf16 %v2262_v53 }
0x13f6   :  { %v1067_v58 = vsel %vm112_vm2, %v2961_v52, %v2264_v54  ;;  %v1078_v59 = vsel %vm115_vm3, 0.0, %v2263_v56 }
0x13f7   :  { %v1080_v62 = vrot.slane %v1078_v59, 6  ;;  %v1073_v63 = vsel %vm115_vm3, %v1067_v58, 0.0 }
0x13f9   :  { %v1082_v0 = vsel %vm83_vm4, %v1073_v63, %v1080_v62 }
0x13fa   :  { %1964 = vmatmul.mubr.f32.vlgmr.msra.gmra.mrb[6].mxu0 %v1082_v0 }
0x13fb   :  { %2017 = vmatprep.mubr.msk.f32.mxu0 %vm2422_vm0, %v2423_v6 }
0x14cd   :  { %v1149_v2 = vpop.f32.mrb[6].mxu0 }
0x14ce   :  { %v1150_v5 = vadd.f32 %v1149_v2, %v2643_v41  ;;  %v1965_v11 = vpop.f32.mrb[7].mxu0  ;;  %v382_v2 = vrot.slane %v2669_v61, 6  ;;  %v60_v61 = vld [vmem:[%s3163_s5] sm:$0xff] }
0x14d0   :  { %2318 = vtanh.f32 %v1150_v5  ;;  %v1567_v15 = vmul.f32 -1.442695, %v1150_v5 }
0x14d2   :  { %2320 = vpow2.f32 %v1567_v15  ;;  %v1020_v15 = vrot.slane %v2908_v60, 6  ;;  %v63_v60 = vld [vmem:[%s3163_s5 + $0x18] sm:$0xff] }
0x14da   :  { %v2319_v14 = vpop.eup %2318 }
0x14db   :  { %1162 = vrot.lane.b32.xlu1 %v2319_v14, %s2424_s16  ;;  %v384_v14 = vsel %vm83_vm4, %v2688_v8, %v382_v2  ;;  %v62_v8 = vld [vmem:[%s3163_s5 + $0x10] sm:$0xff] }
0x14dc   :  { %v2321_v16 = vpop.eup %2320 }
0x14dd   :  { %v1156_v18 = vadd.f32 1.0, %v2321_v16 }
0x14df   :  { %2322 = vrcp.f32 %v1156_v18  ;;  %v61_v18 = vld [vmem:[%s3163_s5 + $0x8] sm:$0xff] }
0x14e9   :  { %v2323_v22 = vpop.eup %2322 }
0x14ea   :  { %v1160_v6 = vmul.f32 %v2323_v22, %v1012_v34  ;;  %v1197_v34 = vld [vmem:[%s1196_s21] sm:$0x1] }
0x14eb   :  { %v2997_v37 = vsel %vm97_vm1, %v1197_v34, %v1570_v36 }
0x154d   :  { %v1163_v24 = vpop.permute.xlu1 %1162 }
0x154e   :  { %v1165_v25 = vmul.f32 %v2323_v22, %v1163_v24  ;;  %v64_v24 = vld [vmem:[%s3163_s5 + $0x20] sm:$0xff] }
0x1550   :  { %1167 = vrot.lane.b32.xlu0 %v1165_v25, %s2425_s3  ;;  %v65_v25 = vld [vmem:[%s3163_s5 + $0x28] sm:$0xff] }
0x15c2   :  { %v1168_v4 = vpop.permute.xlu0 %1167 }
0x15c3   :  { %v2973_v7 = vadd.f32 %v1168_v4, %v1160_v6  ;;  %v2219_v6 = vpack.c.bf16 %v65_v25, %v64_v24  ;;  %v67_v4 = vld [vmem:[%s3163_s5 + $0x38] sm:$0xff] }
0x15c5   :  { %2324 = vtanh.f32 %v2973_v7 }
0x15cf   :  { %v2325_v13 = vpop.eup %2324 }
0x15d0   :  { %1173 = vrot.lane.b32.xlu1 %v2325_v13, %s2424_s16 }
0x1642   :  { %v1174_v17 = vpop.permute.xlu1 %1173 }
0x1643   :  { %v2977_v20 = vmul.f32 %v2323_v22, %v1174_v17  ;;  %v1022_v22 = vsel %vm83_vm4, %v2917_v9, %v1020_v15  ;;  %v66_v9 = vld [vmem:[%s3163_s5 + $0x30] sm:$0xff]  ;;  %s2427_s5 = smov [#allocation5]  }
0x1644   :  { %v2222_v13 = vpack.c.bf16 %v67_v4, %v66_v9 }
0x1645   :  { %v1226_v28 = vrot.slane %v2977_v20, 2 }
0x1647   :  { %1227 = vrot.lane.b32.xlu0 %v1226_v28, %s2424_s16  ;;  %v221_v28 = vrot.slane %v2523_v12, 6  ;;  %v1178_v12 = vrot.slane %v2952_v45, 6 }
0x16b9   :  { %v1228_v31 = vpop.permute.xlu0 %1227 }
0x16ba   :  { %v1230_v29 = vsel %vm112_vm2, %v2984_v30, %v1228_v31  ;;  %v542_v31 = vrot.slane %v2738_v44, 6 }
0x16bb   :  { %v2265_v33 = vpack.i.bf16 %v2977_v20, %v1230_v29  ;;  %v223_v29 = vsel %vm83_vm4, %v2611_v32, %v221_v28 }
0x16bd   :  { %2266 = vrot.lane.b32.xlu1 %v2265_v33, %s2424_s16  ;;  %v544_v33 = vsel %vm83_vm4, %v2757_v50, %v542_v31  ;;  %v1180_v50 = vsel %vm83_vm4, %v2961_v52, %v1178_v12 }
0x172f   :  { %v2267_v40 = vpop.permute.xlu1 %2266 }
0x1730   :  { %v2269_v42 = vunpack.i.h.bf16 %v2267_v40  ;;  %v2268_v43 = vunpack.i.l.bf16 %v2267_v40 }
0x1732   :  { %v1225_v46 = vsel %vm112_vm2, %v2997_v37, %v2269_v42  ;;  %v1236_v47 = vsel %vm115_vm3, 0.0, %v2268_v43 }
0x1733   :  { %v1238_v48 = vrot.slane %v1236_v47, 6  ;;  %v1231_v49 = vsel %vm115_vm3, %v1225_v46, 0.0 }
0x1735   :  { %v1240_v51 = vsel %vm83_vm4, %v1231_v49, %v1238_v48 }
0x1736   :  { %1999 = vmatmul.mubr.f32.vlgmr.msra.gmra.mrb[6].mxu1 %v1240_v51 }
0x1809   :  { %v1307_v53 = vpop.f32.mrb[6].mxu1 }
0x180a   :  { %v1308_v54 = vadd.f32 %v1307_v53, %v2643_v41  ;;  %v2000_v56 = vpop.f32.mrb[7].mxu1  ;;  %v702_v41 = vrot.slane %v2807_v27, 6  ;;  %v2213_v27 = vpack.c.bf16 %v61_v18, %v60_v61 }
0x180c   :  { %2326 = vtanh.f32 %v1308_v54  ;;  %v1573_v59 = vmul.f32 -1.442695, %v1308_v54  ;;  %v704_v16 = vsel %vm83_vm4, %v2826_v35, %v702_v41  ;;  %2214 = vmatpush3.bf16.msra.mxu0 %v2213_v27  ;;  %v2216_v35 = vpack.c.bf16 %v63_v60, %v62_v8 }
0x180d   :  { %2215 = vmatprep.subr.bf16.mxu0 %v2421_v3 }
0x180e   :  { %2328 = vpow2.f32 %v1573_v59 }
0x1810   :  { %2217 = vmatpush3.bf16.msra.mxu0 %v2216_v35 }
0x1811   :  { %2218 = vmatprep.subr.bf16.mxu0 %v2421_v3 }
0x1814   :  { %2220 = vmatpush3.bf16.msra.mxu0 %v2219_v6 }
0x1815   :  { %2221 = vmatprep.subr.bf16.mxu0 %v2421_v3  ;;  %v862_v3 = vrot.slane %v2863_v10, 6 }
0x1816   :  { %v2327_v58 = vpop.eup %2326 }
0x1817   :  { %1320 = vrot.lane.b32.xlu0 %v2327_v58, %s2424_s16  ;;  %v864_v34 = vsel %vm83_vm4, %v2872_v19, %v862_v3 }
0x1818   :  { %v2329_v62 = vpop.eup %2328  ;;  %2223 = vmatpush3.bf16.msra.mxu0 %v2222_v13 }
0x1819   :  { %v1314_v63 = vadd.f32 1.0, %v2329_v62 }
0x181b   :  { %2330 = vrcp.f32 %v1314_v63 }
0x1825   :  { %v3006_v0 = vpop.eup %2330 }
0x1826   :  { %v1318_v17 = vmul.f32 %v3006_v0, %v2973_v7  ;;  %v1336_v7 = vrot.slane %v2984_v30, 6 }
0x1828   :  { %v1338_v32 = vsel %vm83_vm4, %v2997_v37, %v1336_v7 }
0x1889   :  { %v1321_v5 = vpop.permute.xlu0 %1320 }
0x188a   :  { %v1323_v11 = vmul.f32 %v3006_v0, %v1321_v5 }
0x188c   :  { %1325 = vrot.lane.b32.xlu1 %v1323_v11, %s2425_s3 }
0x1890   :  { %386 = vrot.lane.b32.xlu1 %v384_v14, %s2426_s1 }
0x1894   :  { %706 = vrot.lane.b32.xlu1 %v704_v16, %s2426_s1 }
0x1898   :  { %1024 = vrot.lane.b32.xlu1 %v1022_v22, %s2426_s1 }
0x18fe   :  { %v1326_v23 = vpop.permute.xlu1 %1325 }
0x18ff   :  { %v1328_v26 = vadd.f32 %v1326_v23, %v1318_v17 }
0x1901   :  { %2332 = vtanh.f32 %v1328_v26  ;;  %1354 = vrot.lane.b32.xlu0 %v1328_v26, %s2426_s1  ;;  %v1357_v10 = vrot.slane %v1328_v26, 2 }
0x1902   :  { %v387_v40 = vpop.permute.xlu1 %386 }
0x1903   :  { %v389_v52 = vadd.f32 %v387_v40, %v2721_v39 }
0x1905   :  { %225 = vrot.lane.b32.xlu0 %v223_v29, %s2426_s1 }
0x1906   :  { %v707_v43 = vpop.permute.xlu1 %706 }
0x1909   :  { %546 = vrot.lane.b32.xlu0 %v544_v33, %s2426_s1 }
0x190a   :  { %v1025_v39 = vpop.permute.xlu1 %1024 }
0x190b   :  { %v2333_v44 = vpop.eup %2332  ;;  %v1027_v48 = vadd.f32 %v1025_v39, %v2945_v38 }
0x190c   :  { %1331 = vrot.lane.b32.xlu1 %v2333_v44, %s2424_s16 }
0x190d   :  { %866 = vrot.lane.b32.xlu0 %v864_v34, %s2426_s1 }
0x1910   :  { %1340 = vrot.lane.b32.xlu1 %v1338_v32, %s2426_s1 }
0x1911   :  { %1182 = vrot.lane.b32.xlu0 %v1180_v50, %s2426_s1 }
0x1973   :  { %v1355_v45 = vpop.permute.xlu0 %1354 }
0x1974   :  { %v1359_v30 = vsel %vm112_vm2, %v1355_v45, %v1357_v10 }
0x1975   :  { %2018 = vmatmul.mubr.msk.f32.vlgmr.msra.gmra.mrb[8].mxu0 %vm115_vm3, %v1359_v30 }
0x1977   :  { %v226_v19 = vpop.permute.xlu0 %225 }
0x1978   :  { %v228_v36 = vadd.f32 %v226_v19, %v2652_v57  ;;  %v709_v57 = vadd.f32 %v707_v43, %v2856_v1 }
0x197a   :  { %230 = vrot.lane.b32.xlu0 %v228_v36, %s2425_s3  ;;  %235 = vrot.lane.b32.xlu1 %v228_v36, %s2424_s16 }
0x197b   :  { %v547_v37 = vpop.permute.xlu0 %546 }
0x197c   :  { %v549_v42 = vadd.f32 %v547_v37, %v2790_v21 }
0x197e   :  { %391 = vrot.lane.b32.xlu0 %v389_v52, %s2425_s3  ;;  %396 = vrot.lane.b32.xlu1 %v389_v52, %s2424_s16  ;;  %v1332_v21 = vpop.permute.xlu1 %1331 }
0x197f   :  { %v867_v46 = vpop.permute.xlu0 %866  ;;  %v1334_v53 = vmul.f32 %v3006_v0, %v1332_v21 }
0x1980   :  { %v869_v47 = vadd.f32 %v867_v46, %v2901_v55 }
0x1982   :  { %551 = vrot.lane.b32.xlu0 %v549_v42, %s2425_s3  ;;  %556 = vrot.lane.b32.xlu1 %v549_v42, %s2424_s16  ;;  %v1341_v51 = vpop.permute.xlu1 %1340 }
0x1983   :  { %v1183_v49 = vpop.permute.xlu0 %1182  ;;  %v1343_v55 = vadd.f32 %v1341_v51, %v1334_v53 }
0x1984   :  { %v1185_v1 = vadd.f32 %v1183_v49, %v2977_v20 }
0x1986   :  { %711 = vrot.lane.b32.xlu0 %v709_v57, %s2425_s3  ;;  %716 = vrot.lane.b32.xlu1 %v709_v57, %s2424_s16 }
0x198a   :  { %871 = vrot.lane.b32.xlu0 %v869_v47, %s2425_s3  ;;  %875 = vrot.lane.b32.xlu1 %v869_v47, %s2424_s16 }
0x198e   :  { %1029 = vrot.lane.b32.xlu0 %v1027_v48, %s2425_s3  ;;  %1033 = vrot.lane.b32.xlu1 %v1027_v48, %s2424_s16 }
0x1992   :  { %1187 = vrot.lane.b32.xlu0 %v1185_v1, %s2425_s3  ;;  %1191 = vrot.lane.b32.xlu1 %v1185_v1, %s2424_s16 }
0x1996   :  { %1349 = vrot.lane.b32.xlu1 %v1343_v55, %s2424_s16  ;;  %1345 = vrot.lane.b32.xlu0 %v1343_v55, %s2425_s3  ;;  %s1447_s16 = sshll.u32 %s2427_s5, 4  ;;  %s1448_s16 = int_to_ptr.vmem [resolvable:$true] %s1447_s16 }
0x1997   :  { %s2348_s28 = scalar_lea.vmem %s1448_s16, 256  ;;  %p2353_p6 = scmp.lt.s32.totalorder %s1448_s16, %s1448_s16 }
0x1998   :  { %p2349_p5 = scmp.ne.s32.totalorder %s1448_s16, %s2348_s28  ;;  %p2354_p7 = scmp.lt.s32.totalorder %s2348_s28, %s2348_s28 }
0x199a   :  { %p2355_p8 = por %p2354_p7, %p2353_p6 }
0x199c   :  { %p2356_p9 = pnand %p2355_p8, %p2349_p5 }
0x19ec   :  { %v231_v38 = vpop.permute.xlu0 %230  ;;  %v236_v54 = vpop.permute.xlu1 %235 }
0x19ed   :  { %234 = vst.msk [vmem:[#allocation5] sm:$0x3] %vm233_vm5, %v231_v38 }
0x19ee   :  { %240 = vst.msk [vmem:[#allocation5 + $0xc] sm:$0xc] %vm239_vm6, %v236_v54 }
0x19f0   :  { %v392_v20 = vpop.permute.xlu0 %391  ;;  %v397_v56 = vpop.permute.xlu1 %396 }
0x19f1   :  { %395 = vst.msk [vmem:[#allocation5 + $0x2] sm:$0x3] %vm233_vm5, %v392_v20 }
0x19f2   :  { %400 = vst.msk [vmem:[#allocation5 + $0xa] sm:$0xc] %vm239_vm6, %v397_v56 }
0x19f4   :  { %v552_v58 = vpop.permute.xlu0 %551  ;;  %v557_v59 = vpop.permute.xlu1 %556 }
0x19f5   :  { %555 = vst.msk [vmem:[#allocation5 + $0x4] sm:$0x3] %vm233_vm5, %v552_v58 }
0x19f6   :  { %560 = vst.msk [vmem:[#allocation5 + $0x8] sm:$0xc] %vm239_vm6, %v557_v59 }
0x19f8   :  { %v712_v62 = vpop.permute.xlu0 %711  ;;  %v717_v63 = vpop.permute.xlu1 %716 }
0x19f9   :  { %715 = vst.msk [vmem:[#allocation5 + $0x6] sm:$0x3] %vm233_vm5, %v712_v62 }
0x19fa   :  { %720 = vst.msk [vmem:[#allocation5 + $0x6] sm:$0xc] %vm239_vm6, %v717_v63 }
0x19fc   :  { %v872_v0 = vpop.permute.xlu0 %871  ;;  %v876_v2 = vpop.permute.xlu1 %875 }
0x19fd   :  { %874 = vst.msk [vmem:[#allocation5 + $0x8] sm:$0x3] %vm233_vm5, %v872_v0 }
0x19fe   :  { %878 = vst.msk [vmem:[#allocation5 + $0x4] sm:$0xc] %vm239_vm6, %v876_v2 }
0x1a00   :  { %v1030_v5 = vpop.permute.xlu0 %1029  ;;  %v1034_v11 = vpop.permute.xlu1 %1033 }
0x1a01   :  { %1032 = vst.msk [vmem:[#allocation5 + $0xa] sm:$0x3] %vm233_vm5, %v1030_v5 }
0x1a02   :  { %1036 = vst.msk [vmem:[#allocation5 + $0x2] sm:$0xc] %vm239_vm6, %v1034_v11 }
0x1a04   :  { %v1188_v41 = vpop.permute.xlu0 %1187  ;;  %v1192_v14 = vpop.permute.xlu1 %1191 }
0x1a05   :  { %1190 = vst.msk [vmem:[#allocation5 + $0xc] sm:$0x3] %vm233_vm5, %v1188_v41 }
0x1a06   :  { %1194 = vst.msk [vmem:[#allocation5] sm:$0xc] %vm239_vm6, %v1192_v14 }
0x1a08   :  { %v1346_v15 = vpop.permute.xlu0 %1345  ;;  %v1350_v16 = vpop.permute.xlu1 %1349 }
0x1a09   :  { %1348 = vst.msk [vmem:[#allocation5 + $0xe] sm:$0x3] %vm233_vm5, %v1346_v15 }
0x1a0a   :  { %1352 = vst.msk [vmem:[#allocation5 - $0x2] sm:$0xc] %vm239_vm6, %v1350_v16 }
0x1a0b   :  { %2359 = shalt.err (!%p2356_p9)
}
0x1a0c   :  { %s2360_s21 = scalar_lea.hbm %s3165_s7, 256 }
0x1a0d   :  { %p2361_p10 = scmp.ne.s32.totalorder %s3165_s7, %s2360_s21  ;;  %p2364_p11 = scmp.lt.u32.totalorder %s2360_s21, %s3165_s7 }
0x1a0f   :  { %p2366_p12 = pnand %p2364_p11, %p2361_p10 }
0x1a11   :  { %2369 = shalt.err (!%p2366_p12)
}
0x1a12   :  { %s2428_s30 = smov 2   ;;  %v1574_v61 = vld [vmem:[%s3164_s6] ss:$0 sm:$0xff]  ;;  %s2429_s22 = smov [#allocation6]  }
0x1a13   :  { %1453 = dma.vmem_to_hbm [thread:$0]  %s1448_s16, 256, %s3165_s7, [#allocation3], %s2425_s3, %s2425_s3, %s2428_s30  }
0x1a14   :  { %s1460_s24 = sshll.u32 %s2429_s22, 4  ;;  %s1461_s24 = int_to_ptr.vmem [resolvable:$true] %s1460_s24 }
0x1a15   :  { %s2370_s26 = scalar_lea.vmem %s1461_s24, 32  ;;  %p2375_p0 = scmp.lt.s32.totalorder %s1461_s24, %s1461_s24 }
0x1a16   :  { %p2371_p13 = scmp.ne.s32.totalorder %s1461_s24, %s2370_s26  ;;  %p2376_p1 = scmp.lt.s32.totalorder %s2370_s26, %s2370_s26 }
0x1a18   :  { %p2377_p2 = por %p2376_p1, %p2375_p0 }
0x1a1a   :  { %p2378_p3 = pnand %p2377_p2, %p2371_p13 }
0x1a48   :  { %v1435_v18 = vpop.f32.mrb[8].mxu0 }
0x1a49   :  { %v1436_v8 = vadd.f32 %v1574_v61, %v1435_v18  ;;  %v2019_v27 = vpop.f32.mrb[9].mxu0 }
0x1a4b   :  { %2334 = vtanh.f32 %v1436_v8  ;;  %1439 = vst.msk [vmem:[#allocation6] sm:$0x3] %vm233_vm5, %v1436_v8 }
0x1a4c   :  { %2381 = shalt.err (!%p2378_p3)
}
0x1a4d   :  { %s2382_s6 = scalar_lea.hbm %s3166_s8, 32 }
0x1a4e   :  { %p2383_p4 = scmp.ne.s32.totalorder %s3166_s8, %s2382_s6  ;;  %p2386_p5 = scmp.lt.u32.totalorder %s2382_s6, %s3166_s8 }
0x1a50   :  { %p2388_p6 = pnand %p2386_p5, %p2383_p4 }
0x1a52   :  { %2391 = shalt.err (!%p2388_p6)
}
0x1a53   :  { %1463 = dma.vmem_to_hbm [thread:$0]  %s1461_s24, 32, %s3166_s8, [#allocation7]  }
0x1a54   :  { %s2430_s18 = smov [#allocation8]  }
0x1a55   :  { %s1470_s25 = sshll.u32 %s2430_s18, 4  ;;  %v2335_v60 = vpop.eup %2334  ;;  %s1471_s25 = int_to_ptr.vmem [resolvable:$true] %s1470_s25 }
0x1a56   :  { %1441 = vst.msk [vmem:[#allocation8] sm:$0x3] %vm233_vm5, %v2335_v60  ;;  %s2392_s5 = scalar_lea.vmem %s1471_s25, 32  ;;  %p2397_p8 = scmp.lt.s32.totalorder %s1471_s25, %s1471_s25 }
0x1a57   :  { %p2393_p7 = scmp.ne.s32.totalorder %s1471_s25, %s2392_s5  ;;  %p2398_p9 = scmp.lt.s32.totalorder %s2392_s5, %s2392_s5 }
0x1a59   :  { %p2399_p10 = por %p2398_p9, %p2397_p8 }
0x1a5b   :  { %p2400_p11 = pnand %p2399_p10, %p2393_p7 }
0x1a5d   :  { %2403 = shalt.err (!%p2400_p11)
}
0x1a5e   :  { %s2404_s11 = scalar_lea.hbm %s3167_s9, 32 }
0x1a5f   :  { %p2405_p12 = scmp.ne.s32.totalorder %s3167_s9, %s2404_s11  ;;  %p2408_p13 = scmp.lt.u32.totalorder %s2404_s11, %s3167_s9 }
0x1a61   :  { %p2410_p0 = pnand %p2408_p13, %p2405_p12 }
0x1a63   :  { %2413 = shalt.err (!%p2410_p0)
}
0x1a64   :  { %1473 = dma.vmem_to_hbm [thread:$0]  %s1471_s25, 32, %s3167_s9, [#allocation7]  }
0x1a65   :  { %2416 = dma.done.wait [#allocation3], 256  }
0x1a66   :  { %2417 = vsyncadd [#allocation3], 4294967040 }
0x1a67   :  { %2418 = dma.done.wait [#allocation7], 64  }
0x1a68   :  { %2419 = vsyncadd [#allocation7], 4294967232 }
0x1a69   :  { %1483 = vsyncpa [#allocation3], 1 }
0x1a6a   :  { %1484 = vsyncpa [#allocation7], 1 }
0x1a6b   :  { %1485 = vsyncpa [#allocation4], 1 }

</bundles_post_ra>
